<compile_context>
chip_gen: v7x
topology: tpu7x:2x2x1
jax: 0.10.0
libtpu: 0.0.40
codegen_flags: <defaults>
</compile_context>

<pallas_src>
import functools

import jax
import jax.numpy as jnp
from jax.experimental import pallas as pl
from jax.experimental.pallas import tpu as pltpu


# ----------------------------------------------------------------------------
# Fused Pallas kernel
# ----------------------------------------------------------------------------
def _bilstm_fused_kernel(T, Bp, H, L, *refs):
    """refs = (x, [wih_cat_l, whh_bd_l, b_cat_l] * L, fc_w, fc_b, out).

    Packed gate layout over G = 8H lanes (gate-major, fwd/bwd per gate):
        [ i_f i_b | f_f f_b | g_f g_b | o_f o_b ]          each block H wide
    State layout over 2H lanes: [ h_fwd | h_bwd ] (same for c).
    """
    x_ref = refs[0]
    layer_refs = [tuple(refs[1 + 3 * l: 4 + 3 * l]) for l in range(L)]
    wfc_ref, bfc_ref, out_ref = refs[1 + 3 * L:]

    H2 = 2 * H
    G = 8 * H

    # Constant lane mask (hoisted out of all loops): True on forward-direction
    # lanes of the packed gate layout.
    lane = jax.lax.broadcasted_iota(jnp.int32, (Bp, G), 1)
    fwd_lane = (lane % H2) < H

    x_all = x_ref[...].astype(jnp.float32)                    # (T*Bp, F_in)

    out_sum = None
    for l in range(L):
        wih_ref, whh_ref, b_ref = layer_refs[l]
        is_last = (l == L - 1)

        # Hoisted, non-recurrent input projection for BOTH directions in one
        # matmul: (T*Bp, F_in) @ (F_in, 8H) + bias.
        gx = jnp.dot(x_all, wih_ref[...],
                     preferred_element_type=jnp.float32) + b_ref[...]  # (T*Bp, G)
        whh = whh_ref[...]                                    # (2H, G) block-structured

        h_cat = jnp.zeros((Bp, H2), jnp.float32)              # [h_fwd | h_bwd]
        c_cat = jnp.zeros((Bp, H2), jnp.float32)
        s_cat = jnp.zeros((Bp, H2), jnp.float32)
        hf_by_t = [None] * T
        hb_by_t = [None] * T

        for s in range(T):                                    # fully unrolled
            tf = s                                            # forward time index
            tb = T - 1 - s                                    # backward time index
            gx_f = gx[tf * Bp:(tf + 1) * Bp, :]               # aligned (Bp, G)
            gx_b = gx[tb * Bp:(tb + 1) * Bp, :]
            # Forward lanes take time tf's projection, backward lanes time tb's.
            gates = jnp.where(fwd_lane, gx_f, gx_b) + jnp.dot(
                h_cat, whh, preferred_element_type=jnp.float32)        # (Bp, G)

            if_act = jax.nn.sigmoid(gates[:, 0:2 * H2])       # i | f in one EUP call
            i_cat = if_act[:, 0:H2]
            f_cat = if_act[:, H2:2 * H2]
            g_cat = jnp.tanh(gates[:, 2 * H2:3 * H2])
            o_cat = jax.nn.sigmoid(gates[:, 3 * H2:4 * H2])

            c_cat = f_cat * c_cat + i_cat * g_cat
            h_cat = o_cat * jnp.tanh(c_cat)

            if is_last:
                s_cat = s_cat + h_cat                         # running sum over time
            else:
                hf_by_t[tf] = h_cat[:, 0:H]
                hb_by_t[tb] = h_cat[:, H:H2]

        if is_last:
            out_sum = s_cat
        else:
            # Assemble the (T*Bp, 2H) layer output once (pure register values,
            # off the per-step critical path; no VMEM scratch, no partial stores).
            x_all = jnp.concatenate(
                [jnp.concatenate([hf_by_t[t], hb_by_t[t]], axis=1)
                 for t in range(T)], axis=0)

    # Fused mean-over-time + FC head.  out_sum's [fwd | bwd] lane layout matches
    # fc_w's row layout (rows 0:H fwd, H:2H bwd), so no repacking is needed.
    logits = jnp.dot(out_sum, wfc_ref[...], preferred_element_type=jnp.float32)
    out_ref[...] = logits * (1.0 / T) + bfc_ref[...]


# ----------------------------------------------------------------------------
# Host-side weight packing
# ----------------------------------------------------------------------------
def _pack_layer(wih_2, whh_2, b_2, H):
    """Pack one bidirectional layer (PyTorch gate order [i, f, g, o]).

    wih_2: (2, F_in, 4H)   whh_2: (2, H, 4H)   b_2: (2, 1, 4H)
    Returns:
      wih_cat: (F_in, 8H)  both directions' input projections side by side
      whh_bd : (2H, 8H)    block-structured so fwd gates only see h_fwd rows
      b_cat  : (1, 8H)
    """
    F_in = wih_2.shape[1]
    wih_cat = jnp.zeros((F_in, 8 * H), jnp.float32)
    whh_bd = jnp.zeros((2 * H, 8 * H), jnp.float32)
    b_cat = jnp.zeros((1, 8 * H), jnp.float32)
    for k in range(4):          # gate (i, f, g, o)
        for d in range(2):      # direction (fwd, bwd)
            col = slice(k * 2 * H + d * H, k * 2 * H + (d + 1) * H)
            src = slice(k * H, (k + 1) * H)
            wih_cat = wih_cat.at[:, col].set(wih_2[d, :, src])
            whh_bd = whh_bd.at[d * H:(d + 1) * H, col].set(whh_2[d, :, src])
            b_cat = b_cat.at[:, col].set(b_2[d, :, src])
    return wih_cat, whh_bd, b_cat


# ----------------------------------------------------------------------------
# Wrapper
# ----------------------------------------------------------------------------
def bilstm_model_forward(x_btd, params):
    """Forward pass matching BiLSTMModel.forward (eval mode).

    x_btd: (B, T, D) f32
    returns: (B, num_classes) f32
    """
    B, T, D = x_btd.shape
    H = int(params["hidden_dim"])
    C = params["fc_w"].shape[1]
    L = len(params["wih"])

    # Pad batch to the f32 sublane granule so every in-kernel row slice / state
    # tensor is an aligned (8, .) tile.  Padded rows never mix with real rows.
    Bp = max(8, ((B + 7) // 8) * 8)
    x = x_btd.astype(jnp.float32)
    if Bp > B:
        x = jnp.pad(x, ((0, Bp - B), (0, 0), (0, 0)))
    # Time-major, flattened: one fused input-projection matmul per layer.
    x_flat = jnp.transpose(x, (1, 0, 2)).reshape(T * Bp, D)

    in_arrays = [x_flat]
    in_specs = [pl.BlockSpec((T * Bp, D), lambda i: (0, 0))]
    for l in range(L):
        wih_cat, whh_bd, b_cat = _pack_layer(
            params["wih"][l], params["whh"][l], params["b"][l], H)
        in_arrays += [wih_cat, whh_bd, b_cat]
        in_specs += [
            pl.BlockSpec(wih_cat.shape, lambda i: (0, 0)),    # (F_in, 8H)
            pl.BlockSpec(whh_bd.shape, lambda i: (0, 0)),     # (2H,   8H)
            pl.BlockSpec(b_cat.shape, lambda i: (0, 0)),      # (1,    8H)
        ]
    in_arrays += [params["fc_w"], params["fc_b"]]
    in_specs += [
        pl.BlockSpec(params["fc_w"].shape, lambda i: (0, 0)),  # (2H, C)
        pl.BlockSpec(params["fc_b"].shape, lambda i: (0, 0)),  # (1, C)
    ]

    kernel = functools.partial(_bilstm_fused_kernel, T, Bp, H, L)

    out_p = pl.pallas_call(
        kernel,
        out_shape=jax.ShapeDtypeStruct((Bp, C), jnp.float32),
        grid_spec=pltpu.PrefetchScalarGridSpec(
            num_scalar_prefetch=0,
            grid=(1,),
            in_specs=in_specs,
            out_specs=pl.BlockSpec((Bp, C), lambda i: (0, 0)),
        ),
        compiler_params=pltpu.CompilerParams(
            dimension_semantics=("arbitrary",),
        ),
    )(*in_arrays)
    return out_p[:B]


# ----------------------------------------------------------------------------
# Pure-JAX reference (for self-check) and parameter construction
# ----------------------------------------------------------------------------
def _reference_forward(x_btd, params):
    H = int(params["hidden_dim"])
    x = jnp.transpose(x_btd, (1, 0, 2)).astype(jnp.float32)   # (T, B, D)
    B = x.shape[1]
    h_seq = x
    for l in range(len(params["wih"])):
        wih, whh, b = params["wih"][l], params["whh"][l], params["b"][l]
        outs = []
        for d in range(2):
            def step(carry, xt, wih_d=wih[d], whh_d=whh[d], b_d=b[d]):
                h, c = carry
                gates = xt @ wih_d + h @ whh_d + b_d
                i = jax.nn.sigmoid(gates[:, 0 * H:1 * H])
                f = jax.nn.sigmoid(gates[:, 1 * H:2 * H])
                g = jnp.tanh(gates[:, 2 * H:3 * H])
                o = jax.nn.sigmoid(gates[:, 3 * H:4 * H])
                c = f * c + i * g
                h = o * jnp.tanh(c)
                return (h, c), h
            xs = h_seq if d == 0 else jnp.flip(h_seq, axis=0)
            init = (jnp.zeros((B, H), jnp.float32), jnp.zeros((B, H), jnp.float32))
            _, hs = jax.lax.scan(step, init, xs)
            if d == 1:
                hs = jnp.flip(hs, axis=0)
            outs.append(hs)
        h_seq = jnp.concatenate(outs, axis=-1)
    m = jnp.mean(h_seq, axis=0)                                # (B, 2H)
    return m @ params["fc_w"] + params["fc_b"]


def _xavier_uniform(key, torch_shape):
    fan_out, fan_in = torch_shape                              # torch: (out, in)
    bound = (6.0 / (fan_in + fan_out)) ** 0.5
    return jax.random.uniform(key, torch_shape, jnp.float32, -bound, bound)


def make_params(key, input_dim, hidden_dim, num_layers, num_classes):
    wihs, whhs, bs = [], [], []
    for l in range(num_layers):
        in_dim = input_dim if l == 0 else 2 * hidden_dim
        wih_dirs, whh_dirs, b_dirs = [], [], []
        for _ in range(2):  # forward / backward
            key, k1, k2 = jax.random.split(key, 3)
            wih_t = _xavier_uniform(k1, (4 * hidden_dim, in_dim))      # torch layout
            whh_t = _xavier_uniform(k2, (4 * hidden_dim, hidden_dim))
            wih_dirs.append(jnp.transpose(wih_t))                      # (in, 4H)
            whh_dirs.append(jnp.transpose(whh_t))                      # (H, 4H)
            # Module's init_weights zeros all LSTM biases (b_ih + b_hh = 0).
            b_dirs.append(jnp.zeros((1, 4 * hidden_dim), jnp.float32))
        wihs.append(jnp.stack(wih_dirs))                               # (2, in, 4H)
        whhs.append(jnp.stack(whh_dirs))                               # (2, H, 4H)
        bs.append(jnp.stack(b_dirs))                                   # (2, 1, 4H)

    key, kf = jax.random.split(key)
    fc_w = jnp.transpose(_xavier_uniform(kf, (num_classes, 2 * hidden_dim)))  # (2H, C)
    fc_b = jnp.zeros((1, num_classes), jnp.float32)
    return {"wih": wihs, "whh": whhs, "b": bs, "fc_w": fc_w, "fc_b": fc_b,
            "hidden_dim": hidden_dim}


# ----------------------------------------------------------------------------
if __name__ == "__main__":
    # Small shapes consistent with the module: batch=2, seq=8, input_dim=16,
    # hidden_dim=32, num_layers=2, num_classes=3.
    B, T, D = 2, 8, 16
    H, L, C = 32, 2, 3

    key = jax.random.PRNGKey(0)
    kx, kp = jax.random.split(key)
    x = jax.random.normal(kx, (B, T, D), jnp.float32)
    params = make_params(kp, D, H, L, C)

    fwd = jax.jit(functools.partial(bilstm_model_forward, params=params))
    out = fwd(x)
    jax.block_until_ready(out)

    assert out.shape == (B, C), out.shape
    assert out.dtype == jnp.float32

    ref = _reference_forward(x, params)
    max_err = float(jnp.max(jnp.abs(out - ref)))
    assert max_err < 2e-4, f"max abs error vs reference: {max_err}"
    print("KERNEL_OK")
</pallas_src>

<mosaic_0001>
module attributes {stable_mosaic.version = 11 : i64} {
  func.func @_bilstm_fused_kernel(%arg0: i32, %arg1: memref<64x16xf32, #tpu.memory_space<vmem>>, %arg2: memref<16x256xf32, #tpu.memory_space<vmem>>, %arg3: memref<64x256xf32, #tpu.memory_space<vmem>>, %arg4: memref<1x256xf32, #tpu.memory_space<vmem>>, %arg5: memref<64x256xf32, #tpu.memory_space<vmem>>, %arg6: memref<64x256xf32, #tpu.memory_space<vmem>>, %arg7: memref<1x256xf32, #tpu.memory_space<vmem>>, %arg8: memref<64x3xf32, #tpu.memory_space<vmem>>, %arg9: memref<1x3xf32, #tpu.memory_space<vmem>>, %arg10: memref<8x3xf32, #tpu.memory_space<vmem>>) attributes {dimension_semantics = [#tpu.dimension_semantics<arbitrary>], iteration_bounds = array<i64: 1>, scalar_prefetch = 0 : i64, scratch_operands = 0 : i64, tpu.core_type = #tpu.core_type<tc>, window_params = [{pipeline_mode = #tpu.pipeline_mode<synchronous>, transform_indices = @transform_0, window_bounds = array<i64: 64, 16>}, {pipeline_mode = #tpu.pipeline_mode<synchronous>, transform_indices = @transform_1, window_bounds = array<i64: 16, 256>}, {pipeline_mode = #tpu.pipeline_mode<synchronous>, transform_indices = @transform_2, window_bounds = array<i64: 64, 256>}, {pipeline_mode = #tpu.pipeline_mode<synchronous>, transform_indices = @transform_3, window_bounds = array<i64: 1, 256>}, {pipeline_mode = #tpu.pipeline_mode<synchronous>, transform_indices = @transform_4, window_bounds = array<i64: 64, 256>}, {pipeline_mode = #tpu.pipeline_mode<synchronous>, transform_indices = @transform_5, window_bounds = array<i64: 64, 256>}, {pipeline_mode = #tpu.pipeline_mode<synchronous>, transform_indices = @transform_6, window_bounds = array<i64: 1, 256>}, {pipeline_mode = #tpu.pipeline_mode<synchronous>, transform_indices = @transform_7, window_bounds = array<i64: 64, 3>}, {pipeline_mode = #tpu.pipeline_mode<synchronous>, transform_indices = @transform_8, window_bounds = array<i64: 1, 3>}, {pipeline_mode = #tpu.pipeline_mode<synchronous>, transform_indices = @transform_9, window_bounds = array<i64: 8, 3>}]} {
    %0 = tpu.iota {dimensions = array<i32: 1>} : vector<8x256xi32>
    %c64_i32 = arith.constant 64 : i32
    %c0_i32 = arith.constant 0 : i32
    %1 = arith.cmpi eq, %c64_i32, %c0_i32 : i32
    %c1_i32 = arith.constant 1 : i32
    %2 = arith.select %1, %c1_i32, %c64_i32 : i32
    %3 = vector.broadcast %2 : i32 to vector<8x256xi32>
    %4 = arith.remsi %0, %3 : vector<8x256xi32>
    %c0_i32_0 = arith.constant 0 : i32
    %5 = vector.broadcast %c0_i32_0 : i32 to vector<8x256xi32>
    %6 = arith.cmpi ne, %4, %5 : vector<8x256xi32>
    %c0_i32_1 = arith.constant 0 : i32
    %7 = vector.broadcast %c0_i32_1 : i32 to vector<8x256xi32>
    %8 = arith.cmpi slt, %4, %7 : vector<8x256xi32>
    %c0_i32_2 = arith.constant 0 : i32
    %9 = arith.cmpi slt, %2, %c0_i32_2 : i32
    %10 = vector.broadcast %9 : i1 to vector<8x256xi1>
    %11 = vector.broadcast %10 : vector<8x256xi1> to vector<8x256xi1>
    %12 = arith.xori %8, %11 : vector<8x256xi1>
    %13 = arith.andi %12, %6 : vector<8x256xi1>
    %14 = vector.broadcast %2 : i32 to vector<8x256xi32>
    %15 = arith.addi %4, %14 : vector<8x256xi32>
    %16 = arith.select %13, %15, %4 : vector<8x256xi1>, vector<8x256xi32>
    %c32_i32 = arith.constant 32 : i32
    %17 = vector.broadcast %c32_i32 : i32 to vector<8x256xi32>
    %18 = arith.cmpi slt, %16, %17 : vector<8x256xi32>
    %c0 = arith.constant 0 : index
    %c0_3 = arith.constant 0 : index
    %19 = vector.load %arg1[%c0, %c0_3] : memref<64x16xf32, #tpu.memory_space<vmem>>, vector<64x16xf32>
    %c0_4 = arith.constant 0 : index
    %c0_5 = arith.constant 0 : index
    %20 = vector.load %arg2[%c0_4, %c0_5] : memref<16x256xf32, #tpu.memory_space<vmem>>, vector<16x256xf32>
    %cst = arith.constant dense<0.000000e+00> : vector<64x256xf32>
    %21 = tpu.matmul %19, %20, %cst {dimension_numbers = #tpu.dot_dimension_numbers<[1], [0], [0], [1], [0, 0, 1, 1], [], []>} : vector<64x16xf32>, vector<16x256xf32>, vector<64x256xf32> -> vector<64x256xf32>
    %c0_6 = arith.constant 0 : index
    %c0_7 = arith.constant 0 : index
    %22 = vector.load %arg4[%c0_6, %c0_7] : memref<1x256xf32, #tpu.memory_space<vmem>>, vector<1x256xf32>
    %23 = vector.broadcast %22 : vector<1x256xf32> to vector<64x256xf32>
    %24 = arith.addf %21, %23 : vector<64x256xf32>
    %c0_8 = arith.constant 0 : index
    %c0_9 = arith.constant 0 : index
    %25 = vector.load %arg3[%c0_8, %c0_9] : memref<64x256xf32, #tpu.memory_space<vmem>>, vector<64x256xf32>
    %cst_10 = arith.constant 0.000000e+00 : f32
    %26 = vector.broadcast %cst_10 : f32 to vector<8x64xf32>
    %cst_11 = arith.constant 0.000000e+00 : f32
    %27 = vector.broadcast %cst_11 : f32 to vector<8x64xf32>
    %28 = vector.extract_strided_slice %24 {offsets = [0, 0], sizes = [8, 256], strides = [1, 1]} : vector<64x256xf32> to vector<8x256xf32>
    %29 = vector.extract_strided_slice %24 {offsets = [56, 0], sizes = [8, 256], strides = [1, 1]} : vector<64x256xf32> to vector<8x256xf32>
    %30 = arith.select %18, %28, %29 : vector<8x256xi1>, vector<8x256xf32>
    %cst_12 = arith.constant dense<0.000000e+00> : vector<8x256xf32>
    %31 = tpu.matmul %26, %25, %cst_12 {dimension_numbers = #tpu.dot_dimension_numbers<[1], [0], [0], [1], [0, 0, 1, 1], [], []>} : vector<8x64xf32>, vector<64x256xf32>, vector<8x256xf32> -> vector<8x256xf32>
    %32 = arith.addf %30, %31 : vector<8x256xf32>
    %33 = vector.extract_strided_slice %32 {offsets = [0, 0], sizes = [8, 128], strides = [1, 1]} : vector<8x256xf32> to vector<8x128xf32>
    %34 = arith.negf %33 : vector<8x128xf32>
    %35 = math.exp %34 : vector<8x128xf32>
    %cst_13 = arith.constant 1.000000e+00 : f32
    %36 = vector.broadcast %cst_13 : f32 to vector<8x128xf32>
    %37 = arith.addf %36, %35 : vector<8x128xf32>
    %38 = arith.divf %36, %37 : vector<8x128xf32>
    %39 = vector.extract_strided_slice %38 {offsets = [0, 0], sizes = [8, 64], strides = [1, 1]} : vector<8x128xf32> to vector<8x64xf32>
    %40 = vector.extract_strided_slice %38 {offsets = [0, 64], sizes = [8, 64], strides = [1, 1]} : vector<8x128xf32> to vector<8x64xf32>
    %41 = vector.extract_strided_slice %32 {offsets = [0, 128], sizes = [8, 64], strides = [1, 1]} : vector<8x256xf32> to vector<8x64xf32>
    %42 = math.tanh %41 : vector<8x64xf32>
    %43 = vector.extract_strided_slice %32 {offsets = [0, 192], sizes = [8, 64], strides = [1, 1]} : vector<8x256xf32> to vector<8x64xf32>
    %44 = arith.negf %43 : vector<8x64xf32>
    %45 = math.exp %44 : vector<8x64xf32>
    %cst_14 = arith.constant 1.000000e+00 : f32
    %46 = vector.broadcast %cst_14 : f32 to vector<8x64xf32>
    %47 = arith.addf %46, %45 : vector<8x64xf32>
    %48 = arith.divf %46, %47 : vector<8x64xf32>
    %49 = arith.mulf %40, %27 : vector<8x64xf32>
    %50 = arith.mulf %39, %42 : vector<8x64xf32>
    %51 = arith.addf %49, %50 : vector<8x64xf32>
    %52 = math.tanh %51 : vector<8x64xf32>
    %53 = arith.mulf %48, %52 : vector<8x64xf32>
    %54 = vector.extract_strided_slice %53 {offsets = [0, 0], sizes = [8, 32], strides = [1, 1]} : vector<8x64xf32> to vector<8x32xf32>
    %55 = vector.extract_strided_slice %53 {offsets = [0, 32], sizes = [8, 32], strides = [1, 1]} : vector<8x64xf32> to vector<8x32xf32>
    %56 = vector.extract_strided_slice %24 {offsets = [8, 0], sizes = [8, 256], strides = [1, 1]} : vector<64x256xf32> to vector<8x256xf32>
    %57 = vector.extract_strided_slice %24 {offsets = [48, 0], sizes = [8, 256], strides = [1, 1]} : vector<64x256xf32> to vector<8x256xf32>
    %58 = arith.select %18, %56, %57 : vector<8x256xi1>, vector<8x256xf32>
    %cst_15 = arith.constant dense<0.000000e+00> : vector<8x256xf32>
    %59 = tpu.matmul %53, %25, %cst_15 {dimension_numbers = #tpu.dot_dimension_numbers<[1], [0], [0], [1], [0, 0, 1, 1], [], []>} : vector<8x64xf32>, vector<64x256xf32>, vector<8x256xf32> -> vector<8x256xf32>
    %60 = arith.addf %58, %59 : vector<8x256xf32>
    %61 = vector.extract_strided_slice %60 {offsets = [0, 0], sizes = [8, 128], strides = [1, 1]} : vector<8x256xf32> to vector<8x128xf32>
    %62 = arith.negf %61 : vector<8x128xf32>
    %63 = math.exp %62 : vector<8x128xf32>
    %cst_16 = arith.constant 1.000000e+00 : f32
    %64 = vector.broadcast %cst_16 : f32 to vector<8x128xf32>
    %65 = arith.addf %64, %63 : vector<8x128xf32>
    %66 = arith.divf %64, %65 : vector<8x128xf32>
    %67 = vector.extract_strided_slice %66 {offsets = [0, 0], sizes = [8, 64], strides = [1, 1]} : vector<8x128xf32> to vector<8x64xf32>
    %68 = vector.extract_strided_slice %66 {offsets = [0, 64], sizes = [8, 64], strides = [1, 1]} : vector<8x128xf32> to vector<8x64xf32>
    %69 = vector.extract_strided_slice %60 {offsets = [0, 128], sizes = [8, 64], strides = [1, 1]} : vector<8x256xf32> to vector<8x64xf32>
    %70 = math.tanh %69 : vector<8x64xf32>
    %71 = vector.extract_strided_slice %60 {offsets = [0, 192], sizes = [8, 64], strides = [1, 1]} : vector<8x256xf32> to vector<8x64xf32>
    %72 = arith.negf %71 : vector<8x64xf32>
    %73 = math.exp %72 : vector<8x64xf32>
    %cst_17 = arith.constant 1.000000e+00 : f32
    %74 = vector.broadcast %cst_17 : f32 to vector<8x64xf32>
    %75 = arith.addf %74, %73 : vector<8x64xf32>
    %76 = arith.divf %74, %75 : vector<8x64xf32>
    %77 = arith.mulf %68, %51 : vector<8x64xf32>
    %78 = arith.mulf %67, %70 : vector<8x64xf32>
    %79 = arith.addf %77, %78 : vector<8x64xf32>
    %80 = math.tanh %79 : vector<8x64xf32>
    %81 = arith.mulf %76, %80 : vector<8x64xf32>
    %82 = vector.extract_strided_slice %81 {offsets = [0, 0], sizes = [8, 32], strides = [1, 1]} : vector<8x64xf32> to vector<8x32xf32>
    %83 = vector.extract_strided_slice %81 {offsets = [0, 32], sizes = [8, 32], strides = [1, 1]} : vector<8x64xf32> to vector<8x32xf32>
    %84 = vector.extract_strided_slice %24 {offsets = [16, 0], sizes = [8, 256], strides = [1, 1]} : vector<64x256xf32> to vector<8x256xf32>
    %85 = vector.extract_strided_slice %24 {offsets = [40, 0], sizes = [8, 256], strides = [1, 1]} : vector<64x256xf32> to vector<8x256xf32>
    %86 = arith.select %18, %84, %85 : vector<8x256xi1>, vector<8x256xf32>
    %cst_18 = arith.constant dense<0.000000e+00> : vector<8x256xf32>
    %87 = tpu.matmul %81, %25, %cst_18 {dimension_numbers = #tpu.dot_dimension_numbers<[1], [0], [0], [1], [0, 0, 1, 1], [], []>} : vector<8x64xf32>, vector<64x256xf32>, vector<8x256xf32> -> vector<8x256xf32>
    %88 = arith.addf %86, %87 : vector<8x256xf32>
    %89 = vector.extract_strided_slice %88 {offsets = [0, 0], sizes = [8, 128], strides = [1, 1]} : vector<8x256xf32> to vector<8x128xf32>
    %90 = arith.negf %89 : vector<8x128xf32>
    %91 = math.exp %90 : vector<8x128xf32>
    %cst_19 = arith.constant 1.000000e+00 : f32
    %92 = vector.broadcast %cst_19 : f32 to vector<8x128xf32>
    %93 = arith.addf %92, %91 : vector<8x128xf32>
    %94 = arith.divf %92, %93 : vector<8x128xf32>
    %95 = vector.extract_strided_slice %94 {offsets = [0, 0], sizes = [8, 64], strides = [1, 1]} : vector<8x128xf32> to vector<8x64xf32>
    %96 = vector.extract_strided_slice %94 {offsets = [0, 64], sizes = [8, 64], strides = [1, 1]} : vector<8x128xf32> to vector<8x64xf32>
    %97 = vector.extract_strided_slice %88 {offsets = [0, 128], sizes = [8, 64], strides = [1, 1]} : vector<8x256xf32> to vector<8x64xf32>
    %98 = math.tanh %97 : vector<8x64xf32>
    %99 = vector.extract_strided_slice %88 {offsets = [0, 192], sizes = [8, 64], strides = [1, 1]} : vector<8x256xf32> to vector<8x64xf32>
    %100 = arith.negf %99 : vector<8x64xf32>
    %101 = math.exp %100 : vector<8x64xf32>
    %cst_20 = arith.constant 1.000000e+00 : f32
    %102 = vector.broadcast %cst_20 : f32 to vector<8x64xf32>
    %103 = arith.addf %102, %101 : vector<8x64xf32>
    %104 = arith.divf %102, %103 : vector<8x64xf32>
    %105 = arith.mulf %96, %79 : vector<8x64xf32>
    %106 = arith.mulf %95, %98 : vector<8x64xf32>
    %107 = arith.addf %105, %106 : vector<8x64xf32>
    %108 = math.tanh %107 : vector<8x64xf32>
    %109 = arith.mulf %104, %108 : vector<8x64xf32>
    %110 = vector.extract_strided_slice %109 {offsets = [0, 0], sizes = [8, 32], strides = [1, 1]} : vector<8x64xf32> to vector<8x32xf32>
    %111 = vector.extract_strided_slice %109 {offsets = [0, 32], sizes = [8, 32], strides = [1, 1]} : vector<8x64xf32> to vector<8x32xf32>
    %112 = vector.extract_strided_slice %24 {offsets = [24, 0], sizes = [8, 256], strides = [1, 1]} : vector<64x256xf32> to vector<8x256xf32>
    %113 = vector.extract_strided_slice %24 {offsets = [32, 0], sizes = [8, 256], strides = [1, 1]} : vector<64x256xf32> to vector<8x256xf32>
    %114 = arith.select %18, %112, %113 : vector<8x256xi1>, vector<8x256xf32>
    %cst_21 = arith.constant dense<0.000000e+00> : vector<8x256xf32>
    %115 = tpu.matmul %109, %25, %cst_21 {dimension_numbers = #tpu.dot_dimension_numbers<[1], [0], [0], [1], [0, 0, 1, 1], [], []>} : vector<8x64xf32>, vector<64x256xf32>, vector<8x256xf32> -> vector<8x256xf32>
    %116 = arith.addf %114, %115 : vector<8x256xf32>
    %117 = vector.extract_strided_slice %116 {offsets = [0, 0], sizes = [8, 128], strides = [1, 1]} : vector<8x256xf32> to vector<8x128xf32>
    %118 = arith.negf %117 : vector<8x128xf32>
    %119 = math.exp %118 : vector<8x128xf32>
    %cst_22 = arith.constant 1.000000e+00 : f32
    %120 = vector.broadcast %cst_22 : f32 to vector<8x128xf32>
    %121 = arith.addf %120, %119 : vector<8x128xf32>
    %122 = arith.divf %120, %121 : vector<8x128xf32>
    %123 = vector.extract_strided_slice %122 {offsets = [0, 0], sizes = [8, 64], strides = [1, 1]} : vector<8x128xf32> to vector<8x64xf32>
    %124 = vector.extract_strided_slice %122 {offsets = [0, 64], sizes = [8, 64], strides = [1, 1]} : vector<8x128xf32> to vector<8x64xf32>
    %125 = vector.extract_strided_slice %116 {offsets = [0, 128], sizes = [8, 64], strides = [1, 1]} : vector<8x256xf32> to vector<8x64xf32>
    %126 = math.tanh %125 : vector<8x64xf32>
    %127 = vector.extract_strided_slice %116 {offsets = [0, 192], sizes = [8, 64], strides = [1, 1]} : vector<8x256xf32> to vector<8x64xf32>
    %128 = arith.negf %127 : vector<8x64xf32>
    %129 = math.exp %128 : vector<8x64xf32>
    %cst_23 = arith.constant 1.000000e+00 : f32
    %130 = vector.broadcast %cst_23 : f32 to vector<8x64xf32>
    %131 = arith.addf %130, %129 : vector<8x64xf32>
    %132 = arith.divf %130, %131 : vector<8x64xf32>
    %133 = arith.mulf %124, %107 : vector<8x64xf32>
    %134 = arith.mulf %123, %126 : vector<8x64xf32>
    %135 = arith.addf %133, %134 : vector<8x64xf32>
    %136 = math.tanh %135 : vector<8x64xf32>
    %137 = arith.mulf %132, %136 : vector<8x64xf32>
    %138 = vector.extract_strided_slice %137 {offsets = [0, 0], sizes = [8, 32], strides = [1, 1]} : vector<8x64xf32> to vector<8x32xf32>
    %139 = vector.extract_strided_slice %137 {offsets = [0, 32], sizes = [8, 32], strides = [1, 1]} : vector<8x64xf32> to vector<8x32xf32>
    %140 = vector.extract_strided_slice %24 {offsets = [32, 0], sizes = [8, 256], strides = [1, 1]} : vector<64x256xf32> to vector<8x256xf32>
    %141 = vector.extract_strided_slice %24 {offsets = [24, 0], sizes = [8, 256], strides = [1, 1]} : vector<64x256xf32> to vector<8x256xf32>
    %142 = arith.select %18, %140, %141 : vector<8x256xi1>, vector<8x256xf32>
    %cst_24 = arith.constant dense<0.000000e+00> : vector<8x256xf32>
    %143 = tpu.matmul %137, %25, %cst_24 {dimension_numbers = #tpu.dot_dimension_numbers<[1], [0], [0], [1], [0, 0, 1, 1], [], []>} : vector<8x64xf32>, vector<64x256xf32>, vector<8x256xf32> -> vector<8x256xf32>
    %144 = arith.addf %142, %143 : vector<8x256xf32>
    %145 = vector.extract_strided_slice %144 {offsets = [0, 0], sizes = [8, 128], strides = [1, 1]} : vector<8x256xf32> to vector<8x128xf32>
    %146 = arith.negf %145 : vector<8x128xf32>
    %147 = math.exp %146 : vector<8x128xf32>
    %cst_25 = arith.constant 1.000000e+00 : f32
    %148 = vector.broadcast %cst_25 : f32 to vector<8x128xf32>
    %149 = arith.addf %148, %147 : vector<8x128xf32>
    %150 = arith.divf %148, %149 : vector<8x128xf32>
    %151 = vector.extract_strided_slice %150 {offsets = [0, 0], sizes = [8, 64], strides = [1, 1]} : vector<8x128xf32> to vector<8x64xf32>
    %152 = vector.extract_strided_slice %150 {offsets = [0, 64], sizes = [8, 64], strides = [1, 1]} : vector<8x128xf32> to vector<8x64xf32>
    %153 = vector.extract_strided_slice %144 {offsets = [0, 128], sizes = [8, 64], strides = [1, 1]} : vector<8x256xf32> to vector<8x64xf32>
    %154 = math.tanh %153 : vector<8x64xf32>
    %155 = vector.extract_strided_slice %144 {offsets = [0, 192], sizes = [8, 64], strides = [1, 1]} : vector<8x256xf32> to vector<8x64xf32>
    %156 = arith.negf %155 : vector<8x64xf32>
    %157 = math.exp %156 : vector<8x64xf32>
    %cst_26 = arith.constant 1.000000e+00 : f32
    %158 = vector.broadcast %cst_26 : f32 to vector<8x64xf32>
    %159 = arith.addf %158, %157 : vector<8x64xf32>
    %160 = arith.divf %158, %159 : vector<8x64xf32>
    %161 = arith.mulf %152, %135 : vector<8x64xf32>
    %162 = arith.mulf %151, %154 : vector<8x64xf32>
    %163 = arith.addf %161, %162 : vector<8x64xf32>
    %164 = math.tanh %163 : vector<8x64xf32>
    %165 = arith.mulf %160, %164 : vector<8x64xf32>
    %166 = vector.extract_strided_slice %165 {offsets = [0, 0], sizes = [8, 32], strides = [1, 1]} : vector<8x64xf32> to vector<8x32xf32>
    %167 = vector.extract_strided_slice %165 {offsets = [0, 32], sizes = [8, 32], strides = [1, 1]} : vector<8x64xf32> to vector<8x32xf32>
    %168 = vector.extract_strided_slice %24 {offsets = [40, 0], sizes = [8, 256], strides = [1, 1]} : vector<64x256xf32> to vector<8x256xf32>
    %169 = vector.extract_strided_slice %24 {offsets = [16, 0], sizes = [8, 256], strides = [1, 1]} : vector<64x256xf32> to vector<8x256xf32>
    %170 = arith.select %18, %168, %169 : vector<8x256xi1>, vector<8x256xf32>
    %cst_27 = arith.constant dense<0.000000e+00> : vector<8x256xf32>
    %171 = tpu.matmul %165, %25, %cst_27 {dimension_numbers = #tpu.dot_dimension_numbers<[1], [0], [0], [1], [0, 0, 1, 1], [], []>} : vector<8x64xf32>, vector<64x256xf32>, vector<8x256xf32> -> vector<8x256xf32>
    %172 = arith.addf %170, %171 : vector<8x256xf32>
    %173 = vector.extract_strided_slice %172 {offsets = [0, 0], sizes = [8, 128], strides = [1, 1]} : vector<8x256xf32> to vector<8x128xf32>
    %174 = arith.negf %173 : vector<8x128xf32>
    %175 = math.exp %174 : vector<8x128xf32>
    %cst_28 = arith.constant 1.000000e+00 : f32
    %176 = vector.broadcast %cst_28 : f32 to vector<8x128xf32>
    %177 = arith.addf %176, %175 : vector<8x128xf32>
    %178 = arith.divf %176, %177 : vector<8x128xf32>
    %179 = vector.extract_strided_slice %178 {offsets = [0, 0], sizes = [8, 64], strides = [1, 1]} : vector<8x128xf32> to vector<8x64xf32>
    %180 = vector.extract_strided_slice %178 {offsets = [0, 64], sizes = [8, 64], strides = [1, 1]} : vector<8x128xf32> to vector<8x64xf32>
    %181 = vector.extract_strided_slice %172 {offsets = [0, 128], sizes = [8, 64], strides = [1, 1]} : vector<8x256xf32> to vector<8x64xf32>
    %182 = math.tanh %181 : vector<8x64xf32>
    %183 = vector.extract_strided_slice %172 {offsets = [0, 192], sizes = [8, 64], strides = [1, 1]} : vector<8x256xf32> to vector<8x64xf32>
    %184 = arith.negf %183 : vector<8x64xf32>
    %185 = math.exp %184 : vector<8x64xf32>
    %cst_29 = arith.constant 1.000000e+00 : f32
    %186 = vector.broadcast %cst_29 : f32 to vector<8x64xf32>
    %187 = arith.addf %186, %185 : vector<8x64xf32>
    %188 = arith.divf %186, %187 : vector<8x64xf32>
    %189 = arith.mulf %180, %163 : vector<8x64xf32>
    %190 = arith.mulf %179, %182 : vector<8x64xf32>
    %191 = arith.addf %189, %190 : vector<8x64xf32>
    %192 = math.tanh %191 : vector<8x64xf32>
    %193 = arith.mulf %188, %192 : vector<8x64xf32>
    %194 = vector.extract_strided_slice %193 {offsets = [0, 0], sizes = [8, 32], strides = [1, 1]} : vector<8x64xf32> to vector<8x32xf32>
    %195 = vector.extract_strided_slice %193 {offsets = [0, 32], sizes = [8, 32], strides = [1, 1]} : vector<8x64xf32> to vector<8x32xf32>
    %196 = vector.extract_strided_slice %24 {offsets = [48, 0], sizes = [8, 256], strides = [1, 1]} : vector<64x256xf32> to vector<8x256xf32>
    %197 = vector.extract_strided_slice %24 {offsets = [8, 0], sizes = [8, 256], strides = [1, 1]} : vector<64x256xf32> to vector<8x256xf32>
    %198 = arith.select %18, %196, %197 : vector<8x256xi1>, vector<8x256xf32>
    %cst_30 = arith.constant dense<0.000000e+00> : vector<8x256xf32>
    %199 = tpu.matmul %193, %25, %cst_30 {dimension_numbers = #tpu.dot_dimension_numbers<[1], [0], [0], [1], [0, 0, 1, 1], [], []>} : vector<8x64xf32>, vector<64x256xf32>, vector<8x256xf32> -> vector<8x256xf32>
    %200 = arith.addf %198, %199 : vector<8x256xf32>
    %201 = vector.extract_strided_slice %200 {offsets = [0, 0], sizes = [8, 128], strides = [1, 1]} : vector<8x256xf32> to vector<8x128xf32>
    %202 = arith.negf %201 : vector<8x128xf32>
    %203 = math.exp %202 : vector<8x128xf32>
    %cst_31 = arith.constant 1.000000e+00 : f32
    %204 = vector.broadcast %cst_31 : f32 to vector<8x128xf32>
    %205 = arith.addf %204, %203 : vector<8x128xf32>
    %206 = arith.divf %204, %205 : vector<8x128xf32>
    %207 = vector.extract_strided_slice %206 {offsets = [0, 0], sizes = [8, 64], strides = [1, 1]} : vector<8x128xf32> to vector<8x64xf32>
    %208 = vector.extract_strided_slice %206 {offsets = [0, 64], sizes = [8, 64], strides = [1, 1]} : vector<8x128xf32> to vector<8x64xf32>
    %209 = vector.extract_strided_slice %200 {offsets = [0, 128], sizes = [8, 64], strides = [1, 1]} : vector<8x256xf32> to vector<8x64xf32>
    %210 = math.tanh %209 : vector<8x64xf32>
    %211 = vector.extract_strided_slice %200 {offsets = [0, 192], sizes = [8, 64], strides = [1, 1]} : vector<8x256xf32> to vector<8x64xf32>
    %212 = arith.negf %211 : vector<8x64xf32>
    %213 = math.exp %212 : vector<8x64xf32>
    %cst_32 = arith.constant 1.000000e+00 : f32
    %214 = vector.broadcast %cst_32 : f32 to vector<8x64xf32>
    %215 = arith.addf %214, %213 : vector<8x64xf32>
    %216 = arith.divf %214, %215 : vector<8x64xf32>
    %217 = arith.mulf %208, %191 : vector<8x64xf32>
    %218 = arith.mulf %207, %210 : vector<8x64xf32>
    %219 = arith.addf %217, %218 : vector<8x64xf32>
    %220 = math.tanh %219 : vector<8x64xf32>
    %221 = arith.mulf %216, %220 : vector<8x64xf32>
    %222 = vector.extract_strided_slice %221 {offsets = [0, 0], sizes = [8, 32], strides = [1, 1]} : vector<8x64xf32> to vector<8x32xf32>
    %223 = vector.extract_strided_slice %221 {offsets = [0, 32], sizes = [8, 32], strides = [1, 1]} : vector<8x64xf32> to vector<8x32xf32>
    %224 = vector.extract_strided_slice %24 {offsets = [56, 0], sizes = [8, 256], strides = [1, 1]} : vector<64x256xf32> to vector<8x256xf32>
    %225 = vector.extract_strided_slice %24 {offsets = [0, 0], sizes = [8, 256], strides = [1, 1]} : vector<64x256xf32> to vector<8x256xf32>
    %226 = arith.select %18, %224, %225 : vector<8x256xi1>, vector<8x256xf32>
    %cst_33 = arith.constant dense<0.000000e+00> : vector<8x256xf32>
    %227 = tpu.matmul %221, %25, %cst_33 {dimension_numbers = #tpu.dot_dimension_numbers<[1], [0], [0], [1], [0, 0, 1, 1], [], []>} : vector<8x64xf32>, vector<64x256xf32>, vector<8x256xf32> -> vector<8x256xf32>
    %228 = arith.addf %226, %227 : vector<8x256xf32>
    %229 = vector.extract_strided_slice %228 {offsets = [0, 0], sizes = [8, 128], strides = [1, 1]} : vector<8x256xf32> to vector<8x128xf32>
    %230 = arith.negf %229 : vector<8x128xf32>
    %231 = math.exp %230 : vector<8x128xf32>
    %cst_34 = arith.constant 1.000000e+00 : f32
    %232 = vector.broadcast %cst_34 : f32 to vector<8x128xf32>
    %233 = arith.addf %232, %231 : vector<8x128xf32>
    %234 = arith.divf %232, %233 : vector<8x128xf32>
    %235 = vector.extract_strided_slice %234 {offsets = [0, 0], sizes = [8, 64], strides = [1, 1]} : vector<8x128xf32> to vector<8x64xf32>
    %236 = vector.extract_strided_slice %234 {offsets = [0, 64], sizes = [8, 64], strides = [1, 1]} : vector<8x128xf32> to vector<8x64xf32>
    %237 = vector.extract_strided_slice %228 {offsets = [0, 128], sizes = [8, 64], strides = [1, 1]} : vector<8x256xf32> to vector<8x64xf32>
    %238 = math.tanh %237 : vector<8x64xf32>
    %239 = vector.extract_strided_slice %228 {offsets = [0, 192], sizes = [8, 64], strides = [1, 1]} : vector<8x256xf32> to vector<8x64xf32>
    %240 = arith.negf %239 : vector<8x64xf32>
    %241 = math.exp %240 : vector<8x64xf32>
    %cst_35 = arith.constant 1.000000e+00 : f32
    %242 = vector.broadcast %cst_35 : f32 to vector<8x64xf32>
    %243 = arith.addf %242, %241 : vector<8x64xf32>
    %244 = arith.divf %242, %243 : vector<8x64xf32>
    %245 = arith.mulf %236, %219 : vector<8x64xf32>
    %246 = arith.mulf %235, %238 : vector<8x64xf32>
    %247 = arith.addf %245, %246 : vector<8x64xf32>
    %248 = math.tanh %247 : vector<8x64xf32>
    %249 = arith.mulf %244, %248 : vector<8x64xf32>
    %250 = vector.extract_strided_slice %249 {offsets = [0, 0], sizes = [8, 32], strides = [1, 1]} : vector<8x64xf32> to vector<8x32xf32>
    %251 = vector.extract_strided_slice %249 {offsets = [0, 32], sizes = [8, 32], strides = [1, 1]} : vector<8x64xf32> to vector<8x32xf32>
    %252 = tpu.concatenate %54, %251 in 1 : vector<8x32xf32>, vector<8x32xf32> -> vector<8x64xf32>
    %253 = tpu.concatenate %82, %223 in 1 : vector<8x32xf32>, vector<8x32xf32> -> vector<8x64xf32>
    %254 = tpu.concatenate %110, %195 in 1 : vector<8x32xf32>, vector<8x32xf32> -> vector<8x64xf32>
    %255 = tpu.concatenate %138, %167 in 1 : vector<8x32xf32>, vector<8x32xf32> -> vector<8x64xf32>
    %256 = tpu.concatenate %166, %139 in 1 : vector<8x32xf32>, vector<8x32xf32> -> vector<8x64xf32>
    %257 = tpu.concatenate %194, %111 in 1 : vector<8x32xf32>, vector<8x32xf32> -> vector<8x64xf32>
    %258 = tpu.concatenate %222, %83 in 1 : vector<8x32xf32>, vector<8x32xf32> -> vector<8x64xf32>
    %259 = tpu.concatenate %250, %55 in 1 : vector<8x32xf32>, vector<8x32xf32> -> vector<8x64xf32>
    %260 = tpu.concatenate %252, %253, %254, %255, %256, %257, %258, %259 in 0 : vector<8x64xf32>, vector<8x64xf32>, vector<8x64xf32>, vector<8x64xf32>, vector<8x64xf32>, vector<8x64xf32>, vector<8x64xf32>, vector<8x64xf32> -> vector<64x64xf32>
    %c0_36 = arith.constant 0 : index
    %c0_37 = arith.constant 0 : index
    %261 = vector.load %arg5[%c0_36, %c0_37] : memref<64x256xf32, #tpu.memory_space<vmem>>, vector<64x256xf32>
    %cst_38 = arith.constant dense<0.000000e+00> : vector<64x256xf32>
    %262 = tpu.matmul %260, %261, %cst_38 {dimension_numbers = #tpu.dot_dimension_numbers<[1], [0], [0], [1], [0, 0, 1, 1], [], []>} : vector<64x64xf32>, vector<64x256xf32>, vector<64x256xf32> -> vector<64x256xf32>
    %c0_39 = arith.constant 0 : index
    %c0_40 = arith.constant 0 : index
    %263 = vector.load %arg7[%c0_39, %c0_40] : memref<1x256xf32, #tpu.memory_space<vmem>>, vector<1x256xf32>
    %264 = vector.broadcast %263 : vector<1x256xf32> to vector<64x256xf32>
    %265 = arith.addf %262, %264 : vector<64x256xf32>
    %c0_41 = arith.constant 0 : index
    %c0_42 = arith.constant 0 : index
    %266 = vector.load %arg6[%c0_41, %c0_42] : memref<64x256xf32, #tpu.memory_space<vmem>>, vector<64x256xf32>
    %cst_43 = arith.constant 0.000000e+00 : f32
    %267 = vector.broadcast %cst_43 : f32 to vector<8x64xf32>
    %cst_44 = arith.constant 0.000000e+00 : f32
    %268 = vector.broadcast %cst_44 : f32 to vector<8x64xf32>
    %cst_45 = arith.constant 0.000000e+00 : f32
    %269 = vector.broadcast %cst_45 : f32 to vector<8x64xf32>
    %270 = vector.extract_strided_slice %265 {offsets = [0, 0], sizes = [8, 256], strides = [1, 1]} : vector<64x256xf32> to vector<8x256xf32>
    %271 = vector.extract_strided_slice %265 {offsets = [56, 0], sizes = [8, 256], strides = [1, 1]} : vector<64x256xf32> to vector<8x256xf32>
    %272 = arith.select %18, %270, %271 : vector<8x256xi1>, vector<8x256xf32>
    %cst_46 = arith.constant dense<0.000000e+00> : vector<8x256xf32>
    %273 = tpu.matmul %267, %266, %cst_46 {dimension_numbers = #tpu.dot_dimension_numbers<[1], [0], [0], [1], [0, 0, 1, 1], [], []>} : vector<8x64xf32>, vector<64x256xf32>, vector<8x256xf32> -> vector<8x256xf32>
    %274 = arith.addf %272, %273 : vector<8x256xf32>
    %275 = vector.extract_strided_slice %274 {offsets = [0, 0], sizes = [8, 128], strides = [1, 1]} : vector<8x256xf32> to vector<8x128xf32>
    %276 = arith.negf %275 : vector<8x128xf32>
    %277 = math.exp %276 : vector<8x128xf32>
    %cst_47 = arith.constant 1.000000e+00 : f32
    %278 = vector.broadcast %cst_47 : f32 to vector<8x128xf32>
    %279 = arith.addf %278, %277 : vector<8x128xf32>
    %280 = arith.divf %278, %279 : vector<8x128xf32>
    %281 = vector.extract_strided_slice %280 {offsets = [0, 0], sizes = [8, 64], strides = [1, 1]} : vector<8x128xf32> to vector<8x64xf32>
    %282 = vector.extract_strided_slice %280 {offsets = [0, 64], sizes = [8, 64], strides = [1, 1]} : vector<8x128xf32> to vector<8x64xf32>
    %283 = vector.extract_strided_slice %274 {offsets = [0, 128], sizes = [8, 64], strides = [1, 1]} : vector<8x256xf32> to vector<8x64xf32>
    %284 = math.tanh %283 : vector<8x64xf32>
    %285 = vector.extract_strided_slice %274 {offsets = [0, 192], sizes = [8, 64], strides = [1, 1]} : vector<8x256xf32> to vector<8x64xf32>
    %286 = arith.negf %285 : vector<8x64xf32>
    %287 = math.exp %286 : vector<8x64xf32>
    %cst_48 = arith.constant 1.000000e+00 : f32
    %288 = vector.broadcast %cst_48 : f32 to vector<8x64xf32>
    %289 = arith.addf %288, %287 : vector<8x64xf32>
    %290 = arith.divf %288, %289 : vector<8x64xf32>
    %291 = arith.mulf %282, %268 : vector<8x64xf32>
    %292 = arith.mulf %281, %284 : vector<8x64xf32>
    %293 = arith.addf %291, %292 : vector<8x64xf32>
    %294 = math.tanh %293 : vector<8x64xf32>
    %295 = arith.mulf %290, %294 : vector<8x64xf32>
    %296 = arith.addf %269, %295 : vector<8x64xf32>
    %297 = vector.extract_strided_slice %265 {offsets = [8, 0], sizes = [8, 256], strides = [1, 1]} : vector<64x256xf32> to vector<8x256xf32>
    %298 = vector.extract_strided_slice %265 {offsets = [48, 0], sizes = [8, 256], strides = [1, 1]} : vector<64x256xf32> to vector<8x256xf32>
    %299 = arith.select %18, %297, %298 : vector<8x256xi1>, vector<8x256xf32>
    %cst_49 = arith.constant dense<0.000000e+00> : vector<8x256xf32>
    %300 = tpu.matmul %295, %266, %cst_49 {dimension_numbers = #tpu.dot_dimension_numbers<[1], [0], [0], [1], [0, 0, 1, 1], [], []>} : vector<8x64xf32>, vector<64x256xf32>, vector<8x256xf32> -> vector<8x256xf32>
    %301 = arith.addf %299, %300 : vector<8x256xf32>
    %302 = vector.extract_strided_slice %301 {offsets = [0, 0], sizes = [8, 128], strides = [1, 1]} : vector<8x256xf32> to vector<8x128xf32>
    %303 = arith.negf %302 : vector<8x128xf32>
    %304 = math.exp %303 : vector<8x128xf32>
    %cst_50 = arith.constant 1.000000e+00 : f32
    %305 = vector.broadcast %cst_50 : f32 to vector<8x128xf32>
    %306 = arith.addf %305, %304 : vector<8x128xf32>
    %307 = arith.divf %305, %306 : vector<8x128xf32>
    %308 = vector.extract_strided_slice %307 {offsets = [0, 0], sizes = [8, 64], strides = [1, 1]} : vector<8x128xf32> to vector<8x64xf32>
    %309 = vector.extract_strided_slice %307 {offsets = [0, 64], sizes = [8, 64], strides = [1, 1]} : vector<8x128xf32> to vector<8x64xf32>
    %310 = vector.extract_strided_slice %301 {offsets = [0, 128], sizes = [8, 64], strides = [1, 1]} : vector<8x256xf32> to vector<8x64xf32>
    %311 = math.tanh %310 : vector<8x64xf32>
    %312 = vector.extract_strided_slice %301 {offsets = [0, 192], sizes = [8, 64], strides = [1, 1]} : vector<8x256xf32> to vector<8x64xf32>
    %313 = arith.negf %312 : vector<8x64xf32>
    %314 = math.exp %313 : vector<8x64xf32>
    %cst_51 = arith.constant 1.000000e+00 : f32
    %315 = vector.broadcast %cst_51 : f32 to vector<8x64xf32>
    %316 = arith.addf %315, %314 : vector<8x64xf32>
    %317 = arith.divf %315, %316 : vector<8x64xf32>
    %318 = arith.mulf %309, %293 : vector<8x64xf32>
    %319 = arith.mulf %308, %311 : vector<8x64xf32>
    %320 = arith.addf %318, %319 : vector<8x64xf32>
    %321 = math.tanh %320 : vector<8x64xf32>
    %322 = arith.mulf %317, %321 : vector<8x64xf32>
    %323 = arith.addf %296, %322 : vector<8x64xf32>
    %324 = vector.extract_strided_slice %265 {offsets = [16, 0], sizes = [8, 256], strides = [1, 1]} : vector<64x256xf32> to vector<8x256xf32>
    %325 = vector.extract_strided_slice %265 {offsets = [40, 0], sizes = [8, 256], strides = [1, 1]} : vector<64x256xf32> to vector<8x256xf32>
    %326 = arith.select %18, %324, %325 : vector<8x256xi1>, vector<8x256xf32>
    %cst_52 = arith.constant dense<0.000000e+00> : vector<8x256xf32>
    %327 = tpu.matmul %322, %266, %cst_52 {dimension_numbers = #tpu.dot_dimension_numbers<[1], [0], [0], [1], [0, 0, 1, 1], [], []>} : vector<8x64xf32>, vector<64x256xf32>, vector<8x256xf32> -> vector<8x256xf32>
    %328 = arith.addf %326, %327 : vector<8x256xf32>
    %329 = vector.extract_strided_slice %328 {offsets = [0, 0], sizes = [8, 128], strides = [1, 1]} : vector<8x256xf32> to vector<8x128xf32>
    %330 = arith.negf %329 : vector<8x128xf32>
    %331 = math.exp %330 : vector<8x128xf32>
    %cst_53 = arith.constant 1.000000e+00 : f32
    %332 = vector.broadcast %cst_53 : f32 to vector<8x128xf32>
    %333 = arith.addf %332, %331 : vector<8x128xf32>
    %334 = arith.divf %332, %333 : vector<8x128xf32>
    %335 = vector.extract_strided_slice %334 {offsets = [0, 0], sizes = [8, 64], strides = [1, 1]} : vector<8x128xf32> to vector<8x64xf32>
    %336 = vector.extract_strided_slice %334 {offsets = [0, 64], sizes = [8, 64], strides = [1, 1]} : vector<8x128xf32> to vector<8x64xf32>
    %337 = vector.extract_strided_slice %328 {offsets = [0, 128], sizes = [8, 64], strides = [1, 1]} : vector<8x256xf32> to vector<8x64xf32>
    %338 = math.tanh %337 : vector<8x64xf32>
    %339 = vector.extract_strided_slice %328 {offsets = [0, 192], sizes = [8, 64], strides = [1, 1]} : vector<8x256xf32> to vector<8x64xf32>
    %340 = arith.negf %339 : vector<8x64xf32>
    %341 = math.exp %340 : vector<8x64xf32>
    %cst_54 = arith.constant 1.000000e+00 : f32
    %342 = vector.broadcast %cst_54 : f32 to vector<8x64xf32>
    %343 = arith.addf %342, %341 : vector<8x64xf32>
    %344 = arith.divf %342, %343 : vector<8x64xf32>
    %345 = arith.mulf %336, %320 : vector<8x64xf32>
    %346 = arith.mulf %335, %338 : vector<8x64xf32>
    %347 = arith.addf %345, %346 : vector<8x64xf32>
    %348 = math.tanh %347 : vector<8x64xf32>
    %349 = arith.mulf %344, %348 : vector<8x64xf32>
    %350 = arith.addf %323, %349 : vector<8x64xf32>
    %351 = vector.extract_strided_slice %265 {offsets = [24, 0], sizes = [8, 256], strides = [1, 1]} : vector<64x256xf32> to vector<8x256xf32>
    %352 = vector.extract_strided_slice %265 {offsets = [32, 0], sizes = [8, 256], strides = [1, 1]} : vector<64x256xf32> to vector<8x256xf32>
    %353 = arith.select %18, %351, %352 : vector<8x256xi1>, vector<8x256xf32>
    %cst_55 = arith.constant dense<0.000000e+00> : vector<8x256xf32>
    %354 = tpu.matmul %349, %266, %cst_55 {dimension_numbers = #tpu.dot_dimension_numbers<[1], [0], [0], [1], [0, 0, 1, 1], [], []>} : vector<8x64xf32>, vector<64x256xf32>, vector<8x256xf32> -> vector<8x256xf32>
    %355 = arith.addf %353, %354 : vector<8x256xf32>
    %356 = vector.extract_strided_slice %355 {offsets = [0, 0], sizes = [8, 128], strides = [1, 1]} : vector<8x256xf32> to vector<8x128xf32>
    %357 = arith.negf %356 : vector<8x128xf32>
    %358 = math.exp %357 : vector<8x128xf32>
    %cst_56 = arith.constant 1.000000e+00 : f32
    %359 = vector.broadcast %cst_56 : f32 to vector<8x128xf32>
    %360 = arith.addf %359, %358 : vector<8x128xf32>
    %361 = arith.divf %359, %360 : vector<8x128xf32>
    %362 = vector.extract_strided_slice %361 {offsets = [0, 0], sizes = [8, 64], strides = [1, 1]} : vector<8x128xf32> to vector<8x64xf32>
    %363 = vector.extract_strided_slice %361 {offsets = [0, 64], sizes = [8, 64], strides = [1, 1]} : vector<8x128xf32> to vector<8x64xf32>
    %364 = vector.extract_strided_slice %355 {offsets = [0, 128], sizes = [8, 64], strides = [1, 1]} : vector<8x256xf32> to vector<8x64xf32>
    %365 = math.tanh %364 : vector<8x64xf32>
    %366 = vector.extract_strided_slice %355 {offsets = [0, 192], sizes = [8, 64], strides = [1, 1]} : vector<8x256xf32> to vector<8x64xf32>
    %367 = arith.negf %366 : vector<8x64xf32>
    %368 = math.exp %367 : vector<8x64xf32>
    %cst_57 = arith.constant 1.000000e+00 : f32
    %369 = vector.broadcast %cst_57 : f32 to vector<8x64xf32>
    %370 = arith.addf %369, %368 : vector<8x64xf32>
    %371 = arith.divf %369, %370 : vector<8x64xf32>
    %372 = arith.mulf %363, %347 : vector<8x64xf32>
    %373 = arith.mulf %362, %365 : vector<8x64xf32>
    %374 = arith.addf %372, %373 : vector<8x64xf32>
    %375 = math.tanh %374 : vector<8x64xf32>
    %376 = arith.mulf %371, %375 : vector<8x64xf32>
    %377 = arith.addf %350, %376 : vector<8x64xf32>
    %378 = vector.extract_strided_slice %265 {offsets = [32, 0], sizes = [8, 256], strides = [1, 1]} : vector<64x256xf32> to vector<8x256xf32>
    %379 = vector.extract_strided_slice %265 {offsets = [24, 0], sizes = [8, 256], strides = [1, 1]} : vector<64x256xf32> to vector<8x256xf32>
    %380 = arith.select %18, %378, %379 : vector<8x256xi1>, vector<8x256xf32>
    %cst_58 = arith.constant dense<0.000000e+00> : vector<8x256xf32>
    %381 = tpu.matmul %376, %266, %cst_58 {dimension_numbers = #tpu.dot_dimension_numbers<[1], [0], [0], [1], [0, 0, 1, 1], [], []>} : vector<8x64xf32>, vector<64x256xf32>, vector<8x256xf32> -> vector<8x256xf32>
    %382 = arith.addf %380, %381 : vector<8x256xf32>
    %383 = vector.extract_strided_slice %382 {offsets = [0, 0], sizes = [8, 128], strides = [1, 1]} : vector<8x256xf32> to vector<8x128xf32>
    %384 = arith.negf %383 : vector<8x128xf32>
    %385 = math.exp %384 : vector<8x128xf32>
    %cst_59 = arith.constant 1.000000e+00 : f32
    %386 = vector.broadcast %cst_59 : f32 to vector<8x128xf32>
    %387 = arith.addf %386, %385 : vector<8x128xf32>
    %388 = arith.divf %386, %387 : vector<8x128xf32>
    %389 = vector.extract_strided_slice %388 {offsets = [0, 0], sizes = [8, 64], strides = [1, 1]} : vector<8x128xf32> to vector<8x64xf32>
    %390 = vector.extract_strided_slice %388 {offsets = [0, 64], sizes = [8, 64], strides = [1, 1]} : vector<8x128xf32> to vector<8x64xf32>
    %391 = vector.extract_strided_slice %382 {offsets = [0, 128], sizes = [8, 64], strides = [1, 1]} : vector<8x256xf32> to vector<8x64xf32>
    %392 = math.tanh %391 : vector<8x64xf32>
    %393 = vector.extract_strided_slice %382 {offsets = [0, 192], sizes = [8, 64], strides = [1, 1]} : vector<8x256xf32> to vector<8x64xf32>
    %394 = arith.negf %393 : vector<8x64xf32>
    %395 = math.exp %394 : vector<8x64xf32>
    %cst_60 = arith.constant 1.000000e+00 : f32
    %396 = vector.broadcast %cst_60 : f32 to vector<8x64xf32>
    %397 = arith.addf %396, %395 : vector<8x64xf32>
    %398 = arith.divf %396, %397 : vector<8x64xf32>
    %399 = arith.mulf %390, %374 : vector<8x64xf32>
    %400 = arith.mulf %389, %392 : vector<8x64xf32>
    %401 = arith.addf %399, %400 : vector<8x64xf32>
    %402 = math.tanh %401 : vector<8x64xf32>
    %403 = arith.mulf %398, %402 : vector<8x64xf32>
    %404 = arith.addf %377, %403 : vector<8x64xf32>
    %405 = vector.extract_strided_slice %265 {offsets = [40, 0], sizes = [8, 256], strides = [1, 1]} : vector<64x256xf32> to vector<8x256xf32>
    %406 = vector.extract_strided_slice %265 {offsets = [16, 0], sizes = [8, 256], strides = [1, 1]} : vector<64x256xf32> to vector<8x256xf32>
    %407 = arith.select %18, %405, %406 : vector<8x256xi1>, vector<8x256xf32>
    %cst_61 = arith.constant dense<0.000000e+00> : vector<8x256xf32>
    %408 = tpu.matmul %403, %266, %cst_61 {dimension_numbers = #tpu.dot_dimension_numbers<[1], [0], [0], [1], [0, 0, 1, 1], [], []>} : vector<8x64xf32>, vector<64x256xf32>, vector<8x256xf32> -> vector<8x256xf32>
    %409 = arith.addf %407, %408 : vector<8x256xf32>
    %410 = vector.extract_strided_slice %409 {offsets = [0, 0], sizes = [8, 128], strides = [1, 1]} : vector<8x256xf32> to vector<8x128xf32>
    %411 = arith.negf %410 : vector<8x128xf32>
    %412 = math.exp %411 : vector<8x128xf32>
    %cst_62 = arith.constant 1.000000e+00 : f32
    %413 = vector.broadcast %cst_62 : f32 to vector<8x128xf32>
    %414 = arith.addf %413, %412 : vector<8x128xf32>
    %415 = arith.divf %413, %414 : vector<8x128xf32>
    %416 = vector.extract_strided_slice %415 {offsets = [0, 0], sizes = [8, 64], strides = [1, 1]} : vector<8x128xf32> to vector<8x64xf32>
    %417 = vector.extract_strided_slice %415 {offsets = [0, 64], sizes = [8, 64], strides = [1, 1]} : vector<8x128xf32> to vector<8x64xf32>
    %418 = vector.extract_strided_slice %409 {offsets = [0, 128], sizes = [8, 64], strides = [1, 1]} : vector<8x256xf32> to vector<8x64xf32>
    %419 = math.tanh %418 : vector<8x64xf32>
    %420 = vector.extract_strided_slice %409 {offsets = [0, 192], sizes = [8, 64], strides = [1, 1]} : vector<8x256xf32> to vector<8x64xf32>
    %421 = arith.negf %420 : vector<8x64xf32>
    %422 = math.exp %421 : vector<8x64xf32>
    %cst_63 = arith.constant 1.000000e+00 : f32
    %423 = vector.broadcast %cst_63 : f32 to vector<8x64xf32>
    %424 = arith.addf %423, %422 : vector<8x64xf32>
    %425 = arith.divf %423, %424 : vector<8x64xf32>
    %426 = arith.mulf %417, %401 : vector<8x64xf32>
    %427 = arith.mulf %416, %419 : vector<8x64xf32>
    %428 = arith.addf %426, %427 : vector<8x64xf32>
    %429 = math.tanh %428 : vector<8x64xf32>
    %430 = arith.mulf %425, %429 : vector<8x64xf32>
    %431 = arith.addf %404, %430 : vector<8x64xf32>
    %432 = vector.extract_strided_slice %265 {offsets = [48, 0], sizes = [8, 256], strides = [1, 1]} : vector<64x256xf32> to vector<8x256xf32>
    %433 = vector.extract_strided_slice %265 {offsets = [8, 0], sizes = [8, 256], strides = [1, 1]} : vector<64x256xf32> to vector<8x256xf32>
    %434 = arith.select %18, %432, %433 : vector<8x256xi1>, vector<8x256xf32>
    %cst_64 = arith.constant dense<0.000000e+00> : vector<8x256xf32>
    %435 = tpu.matmul %430, %266, %cst_64 {dimension_numbers = #tpu.dot_dimension_numbers<[1], [0], [0], [1], [0, 0, 1, 1], [], []>} : vector<8x64xf32>, vector<64x256xf32>, vector<8x256xf32> -> vector<8x256xf32>
    %436 = arith.addf %434, %435 : vector<8x256xf32>
    %437 = vector.extract_strided_slice %436 {offsets = [0, 0], sizes = [8, 128], strides = [1, 1]} : vector<8x256xf32> to vector<8x128xf32>
    %438 = arith.negf %437 : vector<8x128xf32>
    %439 = math.exp %438 : vector<8x128xf32>
    %cst_65 = arith.constant 1.000000e+00 : f32
    %440 = vector.broadcast %cst_65 : f32 to vector<8x128xf32>
    %441 = arith.addf %440, %439 : vector<8x128xf32>
    %442 = arith.divf %440, %441 : vector<8x128xf32>
    %443 = vector.extract_strided_slice %442 {offsets = [0, 0], sizes = [8, 64], strides = [1, 1]} : vector<8x128xf32> to vector<8x64xf32>
    %444 = vector.extract_strided_slice %442 {offsets = [0, 64], sizes = [8, 64], strides = [1, 1]} : vector<8x128xf32> to vector<8x64xf32>
    %445 = vector.extract_strided_slice %436 {offsets = [0, 128], sizes = [8, 64], strides = [1, 1]} : vector<8x256xf32> to vector<8x64xf32>
    %446 = math.tanh %445 : vector<8x64xf32>
    %447 = vector.extract_strided_slice %436 {offsets = [0, 192], sizes = [8, 64], strides = [1, 1]} : vector<8x256xf32> to vector<8x64xf32>
    %448 = arith.negf %447 : vector<8x64xf32>
    %449 = math.exp %448 : vector<8x64xf32>
    %cst_66 = arith.constant 1.000000e+00 : f32
    %450 = vector.broadcast %cst_66 : f32 to vector<8x64xf32>
    %451 = arith.addf %450, %449 : vector<8x64xf32>
    %452 = arith.divf %450, %451 : vector<8x64xf32>
    %453 = arith.mulf %444, %428 : vector<8x64xf32>
    %454 = arith.mulf %443, %446 : vector<8x64xf32>
    %455 = arith.addf %453, %454 : vector<8x64xf32>
    %456 = math.tanh %455 : vector<8x64xf32>
    %457 = arith.mulf %452, %456 : vector<8x64xf32>
    %458 = arith.addf %431, %457 : vector<8x64xf32>
    %459 = vector.extract_strided_slice %265 {offsets = [56, 0], sizes = [8, 256], strides = [1, 1]} : vector<64x256xf32> to vector<8x256xf32>
    %460 = vector.extract_strided_slice %265 {offsets = [0, 0], sizes = [8, 256], strides = [1, 1]} : vector<64x256xf32> to vector<8x256xf32>
    %461 = arith.select %18, %459, %460 : vector<8x256xi1>, vector<8x256xf32>
    %cst_67 = arith.constant dense<0.000000e+00> : vector<8x256xf32>
    %462 = tpu.matmul %457, %266, %cst_67 {dimension_numbers = #tpu.dot_dimension_numbers<[1], [0], [0], [1], [0, 0, 1, 1], [], []>} : vector<8x64xf32>, vector<64x256xf32>, vector<8x256xf32> -> vector<8x256xf32>
    %463 = arith.addf %461, %462 : vector<8x256xf32>
    %464 = vector.extract_strided_slice %463 {offsets = [0, 0], sizes = [8, 128], strides = [1, 1]} : vector<8x256xf32> to vector<8x128xf32>
    %465 = arith.negf %464 : vector<8x128xf32>
    %466 = math.exp %465 : vector<8x128xf32>
    %cst_68 = arith.constant 1.000000e+00 : f32
    %467 = vector.broadcast %cst_68 : f32 to vector<8x128xf32>
    %468 = arith.addf %467, %466 : vector<8x128xf32>
    %469 = arith.divf %467, %468 : vector<8x128xf32>
    %470 = vector.extract_strided_slice %469 {offsets = [0, 0], sizes = [8, 64], strides = [1, 1]} : vector<8x128xf32> to vector<8x64xf32>
    %471 = vector.extract_strided_slice %469 {offsets = [0, 64], sizes = [8, 64], strides = [1, 1]} : vector<8x128xf32> to vector<8x64xf32>
    %472 = vector.extract_strided_slice %463 {offsets = [0, 128], sizes = [8, 64], strides = [1, 1]} : vector<8x256xf32> to vector<8x64xf32>
    %473 = math.tanh %472 : vector<8x64xf32>
    %474 = vector.extract_strided_slice %463 {offsets = [0, 192], sizes = [8, 64], strides = [1, 1]} : vector<8x256xf32> to vector<8x64xf32>
    %475 = arith.negf %474 : vector<8x64xf32>
    %476 = math.exp %475 : vector<8x64xf32>
    %cst_69 = arith.constant 1.000000e+00 : f32
    %477 = vector.broadcast %cst_69 : f32 to vector<8x64xf32>
    %478 = arith.addf %477, %476 : vector<8x64xf32>
    %479 = arith.divf %477, %478 : vector<8x64xf32>
    %480 = arith.mulf %471, %455 : vector<8x64xf32>
    %481 = arith.mulf %470, %473 : vector<8x64xf32>
    %482 = arith.addf %480, %481 : vector<8x64xf32>
    %483 = math.tanh %482 : vector<8x64xf32>
    %484 = arith.mulf %479, %483 : vector<8x64xf32>
    %485 = arith.addf %458, %484 : vector<8x64xf32>
    %c0_70 = arith.constant 0 : index
    %c0_71 = arith.constant 0 : index
    %486 = vector.load %arg8[%c0_70, %c0_71] : memref<64x3xf32, #tpu.memory_space<vmem>>, vector<64x3xf32>
    %cst_72 = arith.constant dense<0.000000e+00> : vector<8x3xf32>
    %487 = tpu.matmul %485, %486, %cst_72 {dimension_numbers = #tpu.dot_dimension_numbers<[1], [0], [0], [1], [0, 0, 1, 1], [], []>} : vector<8x64xf32>, vector<64x3xf32>, vector<8x3xf32> -> vector<8x3xf32>
    %cst_73 = arith.constant 1.250000e-01 : f32
    %488 = vector.broadcast %cst_73 : f32 to vector<8x3xf32>
    %489 = arith.mulf %487, %488 : vector<8x3xf32>
    %c0_74 = arith.constant 0 : index
    %c0_75 = arith.constant 0 : index
    %490 = vector.load %arg9[%c0_74, %c0_75] : memref<1x3xf32, #tpu.memory_space<vmem>>, vector<1x3xf32>
    %491 = vector.broadcast %490 : vector<1x3xf32> to vector<8x3xf32>
    %492 = arith.addf %489, %491 : vector<8x3xf32>
    %c0_76 = arith.constant 0 : index
    %c0_77 = arith.constant 0 : index
    %493 = vector.load %arg10[%c0_76, %c0_77] : memref<8x3xf32, #tpu.memory_space<vmem>>, vector<8x3xf32>
    tpu.vector_store %arg10[%c0_76, %c0_77], %492 {strides = array<i32>} : memref<8x3xf32, #tpu.memory_space<vmem>>, vector<8x3xf32>,
    return
  }
  func.func @transform_0(%arg0: i32) -> (i32, i32) {
    %c0_i32 = arith.constant 0 : i32
    %c0_i32_0 = arith.constant 0 : i32
    %c0_i32_1 = arith.constant 0 : i32
    return %c0_i32, %c0_i32_0 : i32, i32
  }
  func.func @transform_1(%arg0: i32) -> (i32, i32) {
    %c0_i32 = arith.constant 0 : i32
    %c0_i32_0 = arith.constant 0 : i32
    %c0_i32_1 = arith.constant 0 : i32
    return %c0_i32, %c0_i32_0 : i32, i32
  }
  func.func @transform_2(%arg0: i32) -> (i32, i32) {
    %c0_i32 = arith.constant 0 : i32
    %c0_i32_0 = arith.constant 0 : i32
    %c0_i32_1 = arith.constant 0 : i32
    return %c0_i32, %c0_i32_0 : i32, i32
  }
  func.func @transform_3(%arg0: i32) -> (i32, i32) {
    %c0_i32 = arith.constant 0 : i32
    %c0_i32_0 = arith.constant 0 : i32
    %c0_i32_1 = arith.constant 0 : i32
    return %c0_i32, %c0_i32_0 : i32, i32
  }
  func.func @transform_4(%arg0: i32) -> (i32, i32) {
    %c0_i32 = arith.constant 0 : i32
    %c0_i32_0 = arith.constant 0 : i32
    %c0_i32_1 = arith.constant 0 : i32
    return %c0_i32, %c0_i32_0 : i32, i32
  }
  func.func @transform_5(%arg0: i32) -> (i32, i32) {
    %c0_i32 = arith.constant 0 : i32
    %c0_i32_0 = arith.constant 0 : i32
    %c0_i32_1 = arith.constant 0 : i32
    return %c0_i32, %c0_i32_0 : i32, i32
  }
  func.func @transform_6(%arg0: i32) -> (i32, i32) {
    %c0_i32 = arith.constant 0 : i32
    %c0_i32_0 = arith.constant 0 : i32
    %c0_i32_1 = arith.constant 0 : i32
    return %c0_i32, %c0_i32_0 : i32, i32
  }
  func.func @transform_7(%arg0: i32) -> (i32, i32) {
    %c0_i32 = arith.constant 0 : i32
    %c0_i32_0 = arith.constant 0 : i32
    %c0_i32_1 = arith.constant 0 : i32
    return %c0_i32, %c0_i32_0 : i32, i32
  }
  func.func @transform_8(%arg0: i32) -> (i32, i32) {
    %c0_i32 = arith.constant 0 : i32
    %c0_i32_0 = arith.constant 0 : i32
    %c0_i32_1 = arith.constant 0 : i32
    return %c0_i32, %c0_i32_0 : i32, i32
  }
  func.func @transform_9(%arg0: i32) -> (i32, i32) {
    %c0_i32 = arith.constant 0 : i32
    %c0_i32_0 = arith.constant 0 : i32
    %c0_i32_1 = arith.constant 0 : i32
    return %c0_i32, %c0_i32_0 : i32, i32
  }
}

</mosaic_0001>

<bundles_post_ra>
// kernel: bilstm_model_forward.1
= control target key start
LH: loop header
LB: loop body
LE: loop exit
PB: predicated region body
PF: predicated region fallthrough
CT: control target
= control target key end

     0   :  { %v2748_v3 = vmov 0.0   ;;  %vm85_vm0 = vcmask 130048   ;;  %v32_v39 = vlaneseq  ;;  %vm241_vm3 = vcmask 523264   ;;  %s3655_s1 = inlined_call_operand.vmem [shape: f32[16,256], index: 1, kind: input, shape index: {}]   ;;  %s3656_s2 = inlined_call_operand.vmem [shape: f32[64,256], index: 2, kind: input, shape index: {}]   ;;  %s3657_s0 = inlined_call_operand.vmem [shape: f32[64,16], index: 0, kind: input, shape index: {}]   ;;  %s3658_s3 = inlined_call_operand.vmem [shape: f32[1,256], index: 3, kind: input, shape index: {}, may-alias: {3,6}]   ;;  %s3659_s4 = inlined_call_operand.vmem [shape: f32[64,256], index: 4, kind: input, shape index: {}]   ;;  %s3660_s5 = inlined_call_operand.vmem [shape: f32[64,256], index: 5, kind: input, shape index: {}]   ;;  %s3661_s6 = inlined_call_operand.vmem [shape: f32[1,256], index: 6, kind: input, shape index: {}, may-alias: {3,6}]   ;;  %s3662_s7 = inlined_call_operand.vmem [shape: f32[64,3], index: 7, kind: input, shape index: {}]   ;;  %s3663_s8 = inlined_call_operand.vmem [shape: f32[1,3], index: 8, kind: input, shape index: {}]   ;;  %s3664_s9 = inlined_call_operand.vmem [shape: f32[8,3], index: 9, kind: output, shape index: {}]  }
   0x1   :  { %v70_v0 = vld [vmem:[%s3655_s1 + $0x8] sm:$0xff]  ;;  %v72_v1 = vld [vmem:[%s3655_s1 + $0x18] sm:$0xff]  ;;  %v69_v2 = vld [vmem:[%s3655_s1] sm:$0xff]  ;;  %174 = vmatprep.mubr.f32.mxu0 %v2748_v3  ;;  %309 = vmatprep.mubr.f32.mxu1 %v2748_v3  ;;  %vm1059_vm4 = vcmask 261120   ;;  %vm2751_vm5 = vmmov 0   ;;  %vm2166_vm6 = vcmask 23552  }
   0x2   :  { %v2264_v4 = vpack.c.bf16 %v72_v1, %v70_v0  ;;  %v71_v5 = vld [vmem:[%s3655_s1 + $0x10] sm:$0xff]  ;;  %v224_v7 = vld [vmem:[%s3656_s2 + $0x8] sm:$0xff]  ;;  %v226_v8 = vld [vmem:[%s3656_s2 + $0x18] sm:$0xff]  ;;  %v2948_v40 = vshrl.u32 %v32_v39, 7  ;;  %v33_v49 = vand.u32 127, %v32_v39 }
   0x3   :  { %v2266_v6 = vpack.c.bf16 %v71_v5, %v69_v2  ;;  %v223_v9 = vld [vmem:[%s3656_s2] sm:$0xff]  ;;  %v225_v10 = vld [vmem:[%s3656_s2 + $0x10] sm:$0xff]  ;;  %v2831_v12 = vpack.c.bf16 %v226_v8, %v224_v7  ;;  %v228_v14 = vld [vmem:[%s3656_s2 + $0x28] sm:$0xff] }
   0x4   :  { %2265 = vmatprep.subr.bf16.mxu0 %v2264_v4  ;;  %v61_v11 = vld [vmem:[%s3657_s0] sm:$0xff]  ;;  %v2833_v13 = vpack.c.bf16 %v225_v10, %v223_v9  ;;  %v230_v15 = vld [vmem:[%s3656_s2 + $0x38] sm:$0xff]  ;;  %v229_v18 = vld [vmem:[%s3656_s2 + $0x30] sm:$0xff]  ;;  %v77_v41 = vsub.s32 0, %v2948_v40  ;;  %v81_v44 = vsub.s32 1, %v2948_v40  ;;  %v34_v54 = vadd.s32 128, %v33_v49 }
   0x5   :  { %2267 = vmatpush1.bf16.msra.mxu0 %v2266_v6  ;;  %v2841_v16 = vpack.c.bf16 %v230_v15, %v228_v14  ;;  %v227_v17 = vld [vmem:[%s3656_s2 + $0x20] sm:$0xff]  ;;  %2269 = vmatprep.subr.bf16.mxu1 %v2831_v12  ;;  %v232_v19 = vld [vmem:[%s3656_s2 + $0x48] sm:$0xff]  ;;  %v234_v20 = vld [vmem:[%s3656_s2 + $0x58] sm:$0xff]  ;;  %v39_v58 = vand.u32 63, %v33_v49 }
   0x6   :  { %2301 = vmatprep.subr.bf16.mxu0 %v2831_v12  ;;  %2271 = vmatpush1.bf16.msra.mxu1 %v2833_v13  ;;  %v2859_v21 = vpack.c.bf16 %v229_v18, %v227_v17  ;;  %v62_v22 = vld [vmem:[%s3657_s0 + $0x8] sm:$0xff]  ;;  %v2866_v23 = vpack.c.bf16 %v234_v20, %v232_v19  ;;  %v231_v24 = vld [vmem:[%s3656_s2 + $0x40] sm:$0xff]  ;;  %v233_v25 = vld [vmem:[%s3656_s2 + $0x50] sm:$0xff]  ;;  %v46_v60 = vand.u32 63, %v34_v54 }
   0x7   :  { %2273 = vmatprep.subr.bf16.mxu1 %v2841_v16  ;;  %v236_v26 = vld [vmem:[%s3656_s2 + $0x68] sm:$0xff]  ;;  %v238_v27 = vld [vmem:[%s3656_s2 + $0x78] sm:$0xff]  ;;  %v2884_v28 = vpack.c.bf16 %v233_v25, %v231_v24  ;;  %v63_v29 = vld [vmem:[%s3657_s0 + $0x10] sm:$0xff]  ;;  %vm2971_vm1 = vcmp.lt.s32.totalorder %v39_v58, 32 }
   0x8   :  { %2172 = vmatmul.mubr.msk.f32.vlgmr.msra.gmra.mrb[0].mxu0 %vm85_vm0, %v61_v11  ;;  %v2891_v30 = vpack.c.bf16 %v238_v27, %v236_v26  ;;  %v235_v31 = vld [vmem:[%s3656_s2 + $0x60] sm:$0xff]  ;;  %v237_v32 = vld [vmem:[%s3656_s2 + $0x70] sm:$0xff]  ;;  %v64_v34 = vld [vmem:[%s3657_s0 + $0x18] sm:$0xff]  ;;  %vm2975_vm2 = vcmp.lt.s32.totalorder %v46_v60, 32 }
   0x9   :  { %180 = vmatprep.mubr.f32.mxu0 %v2748_v3  ;;  %2303 = vmatpush1.bf16.msra.mxu0 %v2833_v13  ;;  %v2903_v33 = vpack.c.bf16 %v237_v32, %v235_v31  ;;  %v65_v35 = vld [vmem:[%s3657_s0 + $0x20] sm:$0xff]  ;;  %v66_v36 = vld [vmem:[%s3657_s0 + $0x28] sm:$0xff]  ;;  %v67_v37 = vld [vmem:[%s3657_s0 + $0x30] sm:$0xff] }
   0xa   :  { %2305 = vmatprep.subr.bf16.mxu0 %v2841_v16  ;;  %2275 = vmatpush1.bf16.msra.mxu1 %v2859_v21  ;;  %v68_v38 = vld [vmem:[%s3657_s0 + $0x38] sm:$0xff]  ;;  %v73_v42 = vld [vmem:[%s3658_s3] sm:$0x3]  ;;  %s2749_s0 = smov 64  }
   0xb   :  { %2277 = vmatprep.subr.bf16.mxu1 %v2866_v23  ;;  %v78_v46 = vrot.slane %v73_v42, %v77_v41  ;;  %v82_v47 = vrot.slane %v73_v42, %v81_v44  ;;  %v2074_v5 = vld [vmem:[%s3662_s7] sm:$0xff] }
   0xc   :  { %2173 = vmatmul.mubr.msk.f32.gmra.mrb[2].mxu0 %vm85_vm0, %v62_v22 }
   0xd   :  { %186 = vmatprep.mubr.f32.mxu0 %v2748_v3  ;;  %2307 = vmatpush1.bf16.msra.mxu0 %v2859_v21 }
   0xe   :  { %2309 = vmatprep.subr.bf16.mxu0 %v2866_v23  ;;  %2279 = vmatpush1.bf16.msra.mxu1 %v2884_v28 }
   0xf   :  { %2281 = vmatprep.subr.bf16.mxu1 %v2891_v30 }
  0x10   :  { %2174 = vmatmul.mubr.msk.f32.gmra.mrb[4].mxu0 %vm85_vm0, %v63_v29 }
  0x11   :  { %192 = vmatprep.mubr.f32.mxu0 %v2748_v3  ;;  %2311 = vmatpush1.bf16.msra.mxu0 %v2884_v28 }
  0x12   :  { %2313 = vmatprep.subr.bf16.mxu0 %v2891_v30  ;;  %2283 = vmatpush1.bf16.msra.mxu1 %v2903_v33 }
  0x13   :  { %2285 = vmatprep.subr.bf16.mxu1 %v2831_v12 }
  0x14   :  { %2175 = vmatmul.mubr.msk.f32.gmra.mrb[6].mxu0 %vm85_vm0, %v64_v34 }
  0x15   :  { %198 = vmatprep.mubr.f32.mxu0 %v2748_v3  ;;  %2315 = vmatpush1.bf16.msra.mxu0 %v2903_v33 }
  0x16   :  { %310 = vmatmul.mubr.f32.vlgmr.msra.gmra.mrb[0].mxu1 %v2748_v3  ;;  %2333 = vmatprep.subr.bf16.mxu0 %v2831_v12 }
  0x17   :  { %2287 = vmatpush1.bf16.msra.mxu1 %v2833_v13  ;;  %411 = vmatprep.mubr.f32.mxu1 %v2748_v3 }
  0x18   :  { %2176 = vmatmul.mubr.msk.f32.gmra.mrb[8].mxu0 %vm85_vm0, %v65_v35  ;;  %2289 = vmatprep.subr.bf16.mxu1 %v2841_v16 }
  0x19   :  { %204 = vmatprep.mubr.f32.mxu0 %v2748_v3 }
  0x1b   :  { %2291 = vmatpush1.bf16.msra.mxu1 %v2859_v21 }
  0x1c   :  { %2177 = vmatmul.mubr.msk.f32.gmra.mrb[10].mxu0 %vm85_vm0, %v66_v36  ;;  %2293 = vmatprep.subr.bf16.mxu1 %v2866_v23 }
  0x1d   :  { %210 = vmatprep.mubr.f32.mxu0 %v2748_v3 }
  0x1f   :  { %2295 = vmatpush1.bf16.msra.mxu1 %v2884_v28 }
  0x20   :  { %2178 = vmatmul.mubr.msk.f32.gmra.mrb[12].mxu0 %vm85_vm0, %v67_v37  ;;  %2297 = vmatprep.subr.bf16.mxu1 %v2891_v30 }
  0x21   :  { %216 = vmatprep.mubr.f32.mxu0 %v2748_v3 }
  0x23   :  { %2299 = vmatpush1.bf16.msra.mxu1 %v2903_v33 }
  0x24   :  { %2179 = vmatmul.mubr.msk.f32.gmra.mrb[14].mxu0 %vm85_vm0, %v68_v38  ;;  %2317 = vmatprep.subr.bf16.mxu1 %v2831_v12 }
  0x25   :  { %513 = vmatprep.mubr.f32.mxu0 %v2748_v3 }
  0xdb   :  { %v176_v43 = vpop.f32.mrb[0].mxu0 }
  0xdc   :  { %v178_v45 = vpop.f32.mrb[1].mxu0  ;;  %v3039_v38 = vadd.f32 %v176_v43, %v78_v46 }
  0xdf   :  { %v182_v48 = vpop.f32.mrb[2].mxu0 }
  0xe0   :  { %v2959_v50 = vadd.f32 %v182_v48, %v78_v46  ;;  %v184_v51 = vpop.f32.mrb[3].mxu0  ;;  %v3043_v48 = vadd.f32 %v178_v45, %v82_v47 }
  0xe1   :  { %v2961_v52 = vadd.f32 %v184_v51, %v82_v47 }
  0xe3   :  { %v188_v53 = vpop.f32.mrb[4].mxu0 }
  0xe4   :  { %v2963_v55 = vadd.f32 %v188_v53, %v78_v46  ;;  %v190_v56 = vpop.f32.mrb[5].mxu0 }
  0xe5   :  { %v2965_v57 = vadd.f32 %v190_v56, %v82_v47 }
  0xe7   :  { %v194_v59 = vpop.f32.mrb[6].mxu0 }
  0xe8   :  { %v2967_v61 = vadd.f32 %v194_v59, %v78_v46  ;;  %v196_v62 = vpop.f32.mrb[7].mxu0 }
  0xe9   :  { %v2969_v63 = vadd.f32 %v196_v62, %v82_v47  ;;  %v311_v0 = vpop.f32.mrb[0].mxu1 }
  0xea   :  { %v313_v4 = vpop.f32.mrb[1].mxu1 }
  0xeb   :  { %v200_v2 = vpop.f32.mrb[8].mxu0 }
  0xec   :  { %v2979_v6 = vadd.f32 %v200_v2, %v78_v46  ;;  %v202_v7 = vpop.f32.mrb[9].mxu0 }
  0xed   :  { %v2981_v8 = vadd.f32 %v202_v7, %v82_v47 }
  0xee   :  { %v544_v9 = vsel %vm2971_vm1, %v2967_v61, %v2979_v6  ;;  %v646_v10 = vsel %vm2971_vm1, %v2979_v6, %v2967_v61 }
  0xef   :  { %v206_v11 = vpop.f32.mrb[10].mxu0  ;;  %v545_v14 = vsel %vm2975_vm2, %v2969_v63, %v2981_v8  ;;  %v647_v15 = vsel %vm2975_vm2, %v2981_v8, %v2969_v63 }
  0xf0   :  { %v2999_v17 = vadd.f32 %v206_v11, %v78_v46  ;;  %v208_v18 = vpop.f32.mrb[11].mxu0 }
  0xf1   :  { %v3001_v19 = vadd.f32 %v208_v18, %v82_v47 }
  0xf2   :  { %v442_v20 = vsel %vm2971_vm1, %v2963_v55, %v2999_v17  ;;  %v748_v22 = vsel %vm2971_vm1, %v2999_v17, %v2963_v55 }
  0xf3   :  { %v212_v24 = vpop.f32.mrb[12].mxu0  ;;  %v443_v25 = vsel %vm2975_vm2, %v2965_v57, %v3001_v19  ;;  %v749_v26 = vsel %vm2975_vm2, %v3001_v19, %v2965_v57 }
  0xf4   :  { %v3019_v27 = vadd.f32 %v212_v24, %v78_v46  ;;  %v214_v29 = vpop.f32.mrb[13].mxu0 }
  0xf5   :  { %v3021_v31 = vadd.f32 %v214_v29, %v82_v47 }
  0xf6   :  { %v340_v32 = vsel %vm2971_vm1, %v2959_v50, %v3019_v27  ;;  %v850_v34 = vsel %vm2971_vm1, %v3019_v27, %v2959_v50 }
  0xf7   :  { %v218_v35 = vpop.f32.mrb[14].mxu0  ;;  %v341_v36 = vsel %vm2975_vm2, %v2961_v52, %v3021_v31  ;;  %v851_v37 = vsel %vm2975_vm2, %v3021_v31, %v2961_v52 }
  0xf8   :  { %v3041_v39 = vadd.f32 %v218_v35, %v78_v46  ;;  %v220_v42 = vpop.f32.mrb[15].mxu0 }
  0xf9   :  { %v3045_v49 = vadd.f32 %v220_v42, %v82_v47 }
  0xfa   :  { %v239_v51 = vsel %vm2971_vm1, %v3039_v38, %v3041_v39  ;;  %v952_v53 = vsel %vm2971_vm1, %v3041_v39, %v3039_v38  ;;  %v1075_v38 = vld [vmem:[%s3659_s4 + $0x8] sm:$0xff]  ;;  %v1077_v39 = vld [vmem:[%s3659_s4 + $0x18] sm:$0xff] }
  0xfb   :  { %v316_v54 = vadd.f32 %v311_v0, %v239_v51  ;;  %v240_v43 = vsel %vm2975_vm2, %v3043_v48, %v3045_v49  ;;  %v953_v45 = vsel %vm2975_vm2, %v3045_v49, %v3043_v48  ;;  %v1074_v48 = vld [vmem:[%s3659_s4] sm:$0xff]  ;;  %v2396_v49 = vpack.c.bf16 %v1077_v39, %v1075_v38  ;;  %v1252_v38 = vld [vmem:[%s3660_s5 + $0x68] sm:$0xff]  ;;  %v1254_v39 = vld [vmem:[%s3660_s5 + $0x78] sm:$0xff] }
  0xfc   :  { %v317_v46 = vadd.f32 %v313_v4, %v240_v43 }
  0xfd   :  { %v2180_v47 = vmul.f32 -1.442695, %v316_v54 }
  0xfe   :  { %v2181_v0 = vmul.f32 -1.442695, %v317_v46 }
  0xff   :  { %2556 = vpow2.f32 %v2180_v47 }
 0x100   :  { %2558 = vtanh.f32 %v317_v46 }
 0x109   :  { %v2557_v56 = vpop.eup %2556 }
 0x10a   :  { %v321_v58 = vadd.f32 1.0, %v2557_v56  ;;  %v2559_v59 = vpop.eup %2558 }
 0x10c   :  { %2560 = vrcp.f32 %v321_v58 }
 0x10d   :  { %2562 = vpow2.f32 %v2181_v0 }
 0x116   :  { %v2561_v60 = vpop.eup %2560 }
 0x117   :  { %v332_v62 = vmul.f32 %v2561_v60, %v2559_v59  ;;  %v2563_v2 = vpop.eup %2562  ;;  %v331_v11 = vmul.f32 0.0, %v2561_v60 }
 0x118   :  { %v328_v7 = vadd.f32 1.0, %v2563_v2 }
 0x119   :  { %334 = vrot.lane.b32.xlu0 %v332_v62, %s2749_s0 }
 0x11a   :  { %2564 = vrcp.f32 %v328_v7 }
 0x124   :  { %v2565_v4 = vpop.eup %2564 }
 0x18b   :  { %v335_v18 = vpop.permute.xlu0 %334 }
 0x18c   :  { %v337_v24 = vadd.f32 %v335_v18, %v331_v11 }
 0x18e   :  { %2566 = vtanh.f32 %v337_v24 }
 0x198   :  { %v2567_v29 = vpop.eup %2566 }
 0x199   :  { %v339_v35 = vmul.f32 %v2567_v29, %v2565_v4 }
 0x19b   :  { %343 = vrot.lane.b32.xlu0 %v339_v35, %s2749_s0 }
 0x20d   :  { %v3065_v42 = vpop.permute.xlu0 %343 }
 0x20e   :  { %2182 = vmatmul.mubr.msk.f32.vlgmr.msra.gmra.mrb[2].mxu1 %vm241_vm3, %v3065_v42 }
 0x20f   :  { %2319 = vmatpush1.bf16.msra.mxu1 %v2833_v13  ;;  %615 = vmatprep.mubr.f32.mxu1 %v2748_v3 }
 0x210   :  { %2321 = vmatprep.subr.bf16.mxu1 %v2841_v16 }
 0x213   :  { %2323 = vmatpush1.bf16.msra.mxu1 %v2859_v21 }
 0x214   :  { %2325 = vmatprep.subr.bf16.mxu1 %v2866_v23 }
 0x217   :  { %2327 = vmatpush1.bf16.msra.mxu1 %v2884_v28 }
 0x218   :  { %2329 = vmatprep.subr.bf16.mxu1 %v2891_v30 }
 0x21b   :  { %2331 = vmatpush1.bf16.msra.mxu1 %v2903_v33 }
 0x21c   :  { %2349 = vmatprep.subr.bf16.mxu1 %v2831_v12 }
 0x2e1   :  { %v413_v51 = vpop.f32.mrb[2].mxu1 }
 0x2e2   :  { %v418_v54 = vadd.f32 %v413_v51, %v340_v32  ;;  %v415_v43 = vpop.f32.mrb[3].mxu1 }
 0x2e3   :  { %v419_v46 = vadd.f32 %v415_v43, %v341_v36 }
 0x2e4   :  { %v2183_v47 = vmul.f32 -1.442695, %v418_v54 }
 0x2e5   :  { %v2184_v0 = vmul.f32 -1.442695, %v419_v46 }
 0x2e6   :  { %2568 = vpow2.f32 %v2183_v47 }
 0x2e7   :  { %2570 = vtanh.f32 %v419_v46 }
 0x2f0   :  { %v2569_v56 = vpop.eup %2568 }
 0x2f1   :  { %v423_v58 = vadd.f32 1.0, %v2569_v56  ;;  %v2571_v59 = vpop.eup %2570 }
 0x2f3   :  { %2572 = vrcp.f32 %v423_v58 }
 0x2f4   :  { %2574 = vpow2.f32 %v2184_v0 }
 0x2fd   :  { %v2573_v60 = vpop.eup %2572 }
 0x2fe   :  { %v434_v62 = vmul.f32 %v2573_v60, %v2571_v59  ;;  %v2575_v2 = vpop.eup %2574  ;;  %v433_v11 = vmul.f32 %v2573_v60, %v337_v24 }
 0x2ff   :  { %v430_v7 = vadd.f32 1.0, %v2575_v2 }
 0x300   :  { %436 = vrot.lane.b32.xlu1 %v434_v62, %s2749_s0 }
 0x301   :  { %2576 = vrcp.f32 %v430_v7 }
 0x30b   :  { %v2577_v36 = vpop.eup %2576 }
 0x372   :  { %v437_v18 = vpop.permute.xlu1 %436 }
 0x373   :  { %v439_v32 = vadd.f32 %v437_v18, %v433_v11 }
 0x375   :  { %2578 = vtanh.f32 %v439_v32 }
 0x37f   :  { %v2579_v4 = vpop.eup %2578 }
 0x380   :  { %v441_v29 = vmul.f32 %v2579_v4, %v2577_v36 }
 0x382   :  { %445 = vrot.lane.b32.xlu1 %v441_v29, %s2749_s0 }
 0x3f4   :  { %v3080_v35 = vpop.permute.xlu1 %445 }
 0x3f5   :  { %2185 = vmatmul.mubr.msk.f32.vlgmr.msra.gmra.mrb[16].mxu0 %vm241_vm3, %v3080_v35 }
 0x3f6   :  { %2335 = vmatpush1.bf16.msra.mxu0 %v2833_v13  ;;  %717 = vmatprep.mubr.f32.mxu0 %v2748_v3 }
 0x3f7   :  { %2337 = vmatprep.subr.bf16.mxu0 %v2841_v16 }
 0x3fa   :  { %2339 = vmatpush1.bf16.msra.mxu0 %v2859_v21 }
 0x3fb   :  { %2341 = vmatprep.subr.bf16.mxu0 %v2866_v23 }
 0x3fe   :  { %2343 = vmatpush1.bf16.msra.mxu0 %v2884_v28 }
 0x3ff   :  { %2345 = vmatprep.subr.bf16.mxu0 %v2891_v30 }
 0x402   :  { %2347 = vmatpush1.bf16.msra.mxu0 %v2903_v33 }
 0x403   :  { %2365 = vmatprep.subr.bf16.mxu0 %v2831_v12 }
 0x4c8   :  { %v515_v24 = vpop.f32.mrb[16].mxu0 }
 0x4c9   :  { %v520_v51 = vadd.f32 %v515_v24, %v442_v20  ;;  %v517_v54 = vpop.f32.mrb[17].mxu0 }
 0x4ca   :  { %v521_v43 = vadd.f32 %v517_v54, %v443_v25 }
 0x4cb   :  { %v2186_v46 = vmul.f32 -1.442695, %v520_v51 }
 0x4cc   :  { %v2187_v62 = vmul.f32 -1.442695, %v521_v43 }
 0x4cd   :  { %2580 = vpow2.f32 %v2186_v46 }
 0x4ce   :  { %2582 = vtanh.f32 %v521_v43 }
 0x4d7   :  { %v2581_v47 = vpop.eup %2580 }
 0x4d8   :  { %v525_v56 = vadd.f32 1.0, %v2581_v47  ;;  %v2583_v58 = vpop.eup %2582 }
 0x4da   :  { %2584 = vrcp.f32 %v525_v56 }
 0x4db   :  { %2586 = vpow2.f32 %v2187_v62 }
 0x4e4   :  { %v2585_v59 = vpop.eup %2584 }
 0x4e5   :  { %v536_v60 = vmul.f32 %v2585_v59, %v2583_v58  ;;  %v2587_v20 = vpop.eup %2586  ;;  %v535_v2 = vmul.f32 %v2585_v59, %v439_v32 }
 0x4e6   :  { %v532_v0 = vadd.f32 1.0, %v2587_v20 }
 0x4e7   :  { %538 = vrot.lane.b32.xlu0 %v536_v60, %s2749_s0 }
 0x4e8   :  { %2588 = vrcp.f32 %v532_v0 }
 0x4f2   :  { %v2589_v25 = vpop.eup %2588 }
 0x559   :  { %v539_v7 = vpop.permute.xlu0 %538 }
 0x55a   :  { %v541_v11 = vadd.f32 %v539_v7, %v535_v2 }
 0x55c   :  { %2590 = vtanh.f32 %v541_v11 }
 0x566   :  { %v2591_v18 = vpop.eup %2590 }
 0x567   :  { %v543_v36 = vmul.f32 %v2591_v18, %v2589_v25 }
 0x569   :  { %547 = vrot.lane.b32.xlu1 %v543_v36, %s2749_s0 }
 0x5db   :  { %v3105_v4 = vpop.permute.xlu1 %547 }
 0x5dc   :  { %2188 = vmatmul.mubr.msk.f32.vlgmr.msra.gmra.mrb[4].mxu1 %vm241_vm3, %v3105_v4 }
 0x5dd   :  { %2351 = vmatpush1.bf16.msra.mxu1 %v2833_v13  ;;  %819 = vmatprep.mubr.f32.mxu1 %v2748_v3 }
 0x5de   :  { %2353 = vmatprep.subr.bf16.mxu1 %v2841_v16 }
 0x5e1   :  { %2355 = vmatpush1.bf16.msra.mxu1 %v2859_v21 }
 0x5e2   :  { %2357 = vmatprep.subr.bf16.mxu1 %v2866_v23 }
 0x5e5   :  { %2359 = vmatpush1.bf16.msra.mxu1 %v2884_v28 }
 0x5e6   :  { %2361 = vmatprep.subr.bf16.mxu1 %v2891_v30 }
 0x5e9   :  { %2363 = vmatpush1.bf16.msra.mxu1 %v2903_v33 }
 0x5ea   :  { %2381 = vmatprep.subr.bf16.mxu1 %v2831_v12 }
 0x6af   :  { %v617_v32 = vpop.f32.mrb[4].mxu1 }
 0x6b0   :  { %v622_v29 = vadd.f32 %v617_v32, %v544_v9  ;;  %v619_v24 = vpop.f32.mrb[5].mxu1 }
 0x6b1   :  { %v623_v51 = vadd.f32 %v619_v24, %v545_v14 }
 0x6b2   :  { %v2189_v54 = vmul.f32 -1.442695, %v622_v29 }
 0x6b3   :  { %v2190_v58 = vmul.f32 -1.442695, %v623_v51 }
 0x6b4   :  { %2592 = vpow2.f32 %v2189_v54 }
 0x6b5   :  { %2594 = vtanh.f32 %v623_v51 }
 0x6be   :  { %v2593_v43 = vpop.eup %2592 }
 0x6bf   :  { %v627_v46 = vadd.f32 1.0, %v2593_v43  ;;  %v2595_v12 = vpop.eup %2594 }
 0x6c1   :  { %2596 = vrcp.f32 %v627_v46 }
 0x6c2   :  { %2598 = vpow2.f32 %v2190_v58 }
 0x6cb   :  { %v2597_v47 = vpop.eup %2596 }
 0x6cc   :  { %v638_v56 = vmul.f32 %v2597_v47, %v2595_v12  ;;  %v2599_v9 = vpop.eup %2598  ;;  %v637_v60 = vmul.f32 %v2597_v47, %v541_v11 }
 0x6cd   :  { %v634_v59 = vadd.f32 1.0, %v2599_v9 }
 0x6ce   :  { %640 = vrot.lane.b32.xlu0 %v638_v56, %s2749_s0 }
 0x6cf   :  { %2600 = vrcp.f32 %v634_v59 }
 0x6d9   :  { %v2601_v14 = vpop.eup %2600 }
 0x740   :  { %v641_v62 = vpop.permute.xlu0 %640 }
 0x741   :  { %v643_v20 = vadd.f32 %v641_v62, %v637_v60 }
 0x743   :  { %2602 = vtanh.f32 %v643_v20 }
 0x74d   :  { %v2603_v0 = vpop.eup %2602 }
 0x74e   :  { %v645_v2 = vmul.f32 %v2603_v0, %v2601_v14 }
 0x750   :  { %649 = vrot.lane.b32.xlu1 %v645_v2, %s2749_s0 }
 0x7c2   :  { %v3130_v7 = vpop.permute.xlu1 %649 }
 0x7c3   :  { %2191 = vmatmul.mubr.msk.f32.vlgmr.msra.gmra.mrb[18].mxu0 %vm241_vm3, %v3130_v7 }
 0x7c4   :  { %2367 = vmatpush1.bf16.msra.mxu0 %v2833_v13  ;;  %921 = vmatprep.mubr.f32.mxu0 %v2748_v3 }
 0x7c5   :  { %2369 = vmatprep.subr.bf16.mxu0 %v2841_v16 }
 0x7c8   :  { %2371 = vmatpush1.bf16.msra.mxu0 %v2859_v21 }
 0x7c9   :  { %2373 = vmatprep.subr.bf16.mxu0 %v2866_v23 }
 0x7cc   :  { %2375 = vmatpush1.bf16.msra.mxu0 %v2884_v28 }
 0x7cd   :  { %2377 = vmatprep.subr.bf16.mxu0 %v2891_v30 }
 0x7d0   :  { %2379 = vmatpush1.bf16.msra.mxu0 %v2903_v33 }
 0x7d1   :  { %2397 = vmatprep.subr.bf16.mxu0 %v2396_v49  ;;  %v1251_v49 = vld [vmem:[%s3660_s5 + $0x60] sm:$0xff] }
 0x896   :  { %v719_v11 = vpop.f32.mrb[18].mxu0 }
 0x897   :  { %v724_v25 = vadd.f32 %v719_v11, %v646_v10  ;;  %v721_v18 = vpop.f32.mrb[19].mxu0 }
 0x898   :  { %v725_v36 = vadd.f32 %v721_v18, %v647_v15 }
 0x899   :  { %v2192_v32 = vmul.f32 -1.442695, %v724_v25 }
 0x89a   :  { %v2193_v61 = vmul.f32 -1.442695, %v725_v36 }
 0x89b   :  { %2604 = vpow2.f32 %v2192_v32 }
 0x89c   :  { %2606 = vtanh.f32 %v725_v36 }
 0x8a5   :  { %v2605_v29 = vpop.eup %2604 }
 0x8a6   :  { %v729_v24 = vadd.f32 1.0, %v2605_v29  ;;  %v2607_v51 = vpop.eup %2606 }
 0x8a8   :  { %2608 = vrcp.f32 %v729_v24 }
 0x8a9   :  { %2610 = vpow2.f32 %v2193_v61 }
 0x8b2   :  { %v2609_v54 = vpop.eup %2608 }
 0x8b3   :  { %v740_v43 = vmul.f32 %v2609_v54, %v2607_v51  ;;  %v2611_v6 = vpop.eup %2610  ;;  %v739_v46 = vmul.f32 %v2609_v54, %v643_v20 }
 0x8b4   :  { %v736_v10 = vadd.f32 1.0, %v2611_v6 }
 0x8b5   :  { %742 = vrot.lane.b32.xlu0 %v740_v43, %s2749_s0 }
 0x8b6   :  { %2612 = vrcp.f32 %v736_v10 }
 0x8c0   :  { %v2613_v63 = vpop.eup %2612 }
 0x927   :  { %v743_v12 = vpop.permute.xlu0 %742 }
 0x928   :  { %v745_v47 = vadd.f32 %v743_v12, %v739_v46 }
 0x92a   :  { %2614 = vtanh.f32 %v745_v47 }
 0x934   :  { %v2615_v8 = vpop.eup %2614 }
 0x935   :  { %v747_v15 = vmul.f32 %v2615_v8, %v2613_v63 }
 0x937   :  { %751 = vrot.lane.b32.xlu1 %v747_v15, %s2749_s0 }
 0x9a9   :  { %v3154_v56 = vpop.permute.xlu1 %751 }
 0x9aa   :  { %2194 = vmatmul.mubr.msk.f32.vlgmr.msra.gmra.mrb[6].mxu1 %vm241_vm3, %v3154_v56 }
 0x9ab   :  { %2383 = vmatpush1.bf16.msra.mxu1 %v2833_v13  ;;  %1023 = vmatprep.mubr.f32.mxu1 %v2748_v3 }
 0x9ac   :  { %2385 = vmatprep.subr.bf16.mxu1 %v2841_v16 }
 0x9af   :  { %2387 = vmatpush1.bf16.msra.mxu1 %v2859_v21 }
 0x9b0   :  { %2389 = vmatprep.subr.bf16.mxu1 %v2866_v23 }
 0x9b3   :  { %2391 = vmatpush1.bf16.msra.mxu1 %v2884_v28 }
 0x9b4   :  { %2393 = vmatprep.subr.bf16.mxu1 %v2891_v30 }
 0x9b7   :  { %2395 = vmatpush1.bf16.msra.mxu1 %v2903_v33 }
 0xa7d   :  { %v821_v58 = vpop.f32.mrb[6].mxu1 }
 0xa7e   :  { %v826_v13 = vadd.f32 %v821_v58, %v748_v22  ;;  %v823_v9 = vpop.f32.mrb[7].mxu1 }
 0xa7f   :  { %v827_v16 = vadd.f32 %v823_v9, %v749_v26 }
 0xa80   :  { %v2195_v21 = vmul.f32 -1.442695, %v826_v13 }
 0xa81   :  { %v2196_v55 = vmul.f32 -1.442695, %v827_v16 }
 0xa82   :  { %2616 = vpow2.f32 %v2195_v21 }
 0xa83   :  { %2618 = vtanh.f32 %v827_v16  ;;  %v1081_v16 = vld [vmem:[%s3659_s4 + $0x38] sm:$0xff] }
 0xa8c   :  { %v2617_v23 = vpop.eup %2616 }
 0xa8d   :  { %v831_v28 = vadd.f32 1.0, %v2617_v23  ;;  %v2619_v30 = vpop.eup %2618 }
 0xa8f   :  { %2620 = vrcp.f32 %v831_v28  ;;  %v1078_v28 = vld [vmem:[%s3659_s4 + $0x20] sm:$0xff] }
 0xa90   :  { %2622 = vpow2.f32 %v2196_v55 }
 0xa99   :  { %v2621_v33 = vpop.eup %2620 }
 0xa9a   :  { %v842_v59 = vmul.f32 %v2621_v33, %v2619_v30  ;;  %v2623_v17 = vpop.eup %2622  ;;  %v841_v60 = vmul.f32 %v2621_v33, %v745_v47  ;;  %v1080_v30 = vld [vmem:[%s3659_s4 + $0x30] sm:$0xff]  ;;  %v1083_v33 = vld [vmem:[%s3659_s4 + $0x48] sm:$0xff] }
 0xa9b   :  { %v838_v22 = vadd.f32 1.0, %v2623_v17  ;;  %v2402_v55 = vpack.c.bf16 %v1080_v30, %v1078_v28  ;;  %v1069_v30 = vsel %vm1059_vm4, %v3130_v7, %v3154_v56 }
 0xa9c   :  { %844 = vrot.lane.b32.xlu0 %v842_v59, %s2749_s0  ;;  %v1085_v59 = vld [vmem:[%s3659_s4 + $0x58] sm:$0xff] }
 0xa9d   :  { %2624 = vrcp.f32 %v838_v22  ;;  %v2404_v17 = vpack.c.bf16 %v1085_v59, %v1083_v33  ;;  %v1082_v22 = vld [vmem:[%s3659_s4 + $0x40] sm:$0xff]  ;;  %v1070_v33 = vsel %vm1059_vm4, %v3154_v56, %v3130_v7 }
 0xaa7   :  { %v2625_v57 = vpop.eup %2624 }
 0xb0e   :  { %v845_v62 = vpop.permute.xlu0 %844 }
 0xb0f   :  { %v847_v20 = vadd.f32 %v845_v62, %v841_v60  ;;  %v1084_v60 = vld [vmem:[%s3659_s4 + $0x50] sm:$0xff]  ;;  %v1087_v62 = vld [vmem:[%s3659_s4 + $0x68] sm:$0xff] }
 0xb11   :  { %2626 = vtanh.f32 %v847_v20 }
 0xb1b   :  { %v2627_v19 = vpop.eup %2626 }
 0xb1c   :  { %v849_v26 = vmul.f32 %v2627_v19, %v2625_v57  ;;  %v2406_v57 = vpack.c.bf16 %v1084_v60, %v1082_v22 }
 0xb1e   :  { %853 = vrot.lane.b32.xlu1 %v849_v26, %s2749_s0  ;;  %v1086_v26 = vld [vmem:[%s3659_s4 + $0x60] sm:$0xff] }
 0xb90   :  { %v3178_v14 = vpop.permute.xlu1 %853 }
 0xb91   :  { %2197 = vmatmul.mubr.msk.f32.vlgmr.msra.gmra.mrb[20].mxu0 %vm241_vm3, %v3178_v14  ;;  %v1066_v28 = vsel %vm1059_vm4, %v3105_v4, %v3178_v14  ;;  %v1071_v59 = vsel %vm1059_vm4, %v3178_v14, %v3105_v4  ;;  %v1090_v14 = vld [vmem:[%s3661_s6] sm:$0x3] }
 0xb92   :  { %1190 = vmatprep.mubr.f32.mxu0 %v2748_v3 }
 0xc64   :  { %v923_v0 = vpop.f32.mrb[20].mxu0 }
 0xc65   :  { %v928_v2 = vadd.f32 %v923_v0, %v850_v34  ;;  %v925_v11 = vpop.f32.mrb[21].mxu0  ;;  %v1088_v0 = vld [vmem:[%s3659_s4 + $0x70] sm:$0xff] }
 0xc66   :  { %v929_v25 = vadd.f32 %v925_v11, %v851_v37 }
 0xc67   :  { %v2198_v18 = vmul.f32 -1.442695, %v928_v2  ;;  %v2410_v2 = vpack.c.bf16 %v1088_v0, %v1086_v26 }
 0xc68   :  { %v2199_v50 = vmul.f32 -1.442695, %v929_v25 }
 0xc69   :  { %2628 = vpow2.f32 %v2198_v18 }
 0xc6a   :  { %2630 = vtanh.f32 %v929_v25 }
 0xc73   :  { %v2629_v36 = vpop.eup %2628 }
 0xc74   :  { %v933_v32 = vadd.f32 1.0, %v2629_v36  ;;  %v2631_v29 = vpop.eup %2630 }
 0xc76   :  { %2632 = vrcp.f32 %v933_v32 }
 0xc77   :  { %2634 = vpow2.f32 %v2199_v50 }
 0xc80   :  { %v2633_v24 = vpop.eup %2632 }
 0xc81   :  { %v944_v51 = vmul.f32 %v2633_v24, %v2631_v29  ;;  %v2635_v27 = vpop.eup %2634  ;;  %v943_v54 = vmul.f32 %v2633_v24, %v847_v20  ;;  %v1089_v20 = vld [vmem:[%s3659_s4 + $0x78] sm:$0xff] }
 0xc82   :  { %v940_v34 = vadd.f32 1.0, %v2635_v27  ;;  %v2408_v19 = vpack.c.bf16 %v1089_v20, %v1087_v62  ;;  %v1240_v27 = vld [vmem:[%s3660_s5 + $0x8] sm:$0xff] }
 0xc83   :  { %946 = vrot.lane.b32.xlu0 %v944_v51, %s2749_s0 }
 0xc84   :  { %2636 = vrcp.f32 %v940_v34  ;;  %v1242_v34 = vld [vmem:[%s3660_s5 + $0x18] sm:$0xff] }
 0xc8e   :  { %v2637_v52 = vpop.eup %2636 }
 0xcf5   :  { %v947_v43 = vpop.permute.xlu0 %946 }
 0xcf6   :  { %v949_v61 = vadd.f32 %v947_v43, %v943_v54  ;;  %v3266_v54 = vpack.c.bf16 %v1242_v34, %v1240_v27  ;;  %v1239_v43 = vld [vmem:[%s3660_s5] sm:$0xff] }
 0xcf8   :  { %2638 = vtanh.f32 %v949_v61  ;;  %2413 = vmatprep.subr.bf16.mxu1 %v3266_v54 }
 0xd02   :  { %v2639_v31 = vpop.eup %2638 }
 0xd03   :  { %v951_v37 = vmul.f32 %v2639_v31, %v2637_v52  ;;  %v1244_v31 = vld [vmem:[%s3660_s5 + $0x28] sm:$0xff] }
 0xd05   :  { %955 = vrot.lane.b32.xlu1 %v951_v37, %s2749_s0  ;;  %v1246_v37 = vld [vmem:[%s3660_s5 + $0x38] sm:$0xff] }
 0xd77   :  { %v3195_v6 = vpop.permute.xlu1 %955 }
 0xd78   :  { %2200 = vmatmul.mubr.msk.f32.vlgmr.msra.gmra.mrb[8].mxu1 %vm241_vm3, %v3195_v6 }
 0xd79   :  { %1321 = vmatprep.mubr.f32.mxu1 %v2748_v3 }
 0xe4b   :  { %v1025_v10 = vpop.f32.mrb[8].mxu1 }
 0xe4c   :  { %v1030_v46 = vadd.f32 %v1025_v10, %v952_v53  ;;  %v1027_v12 = vpop.f32.mrb[9].mxu1  ;;  %v1076_v53 = vld [vmem:[%s3659_s4 + $0x10] sm:$0xff]  ;;  %v3285_v10 = vpack.c.bf16 %v1246_v37, %v1244_v31 }
 0xe4d   :  { %v1031_v47 = vadd.f32 %v1027_v12, %v953_v45  ;;  %v1079_v45 = vld [vmem:[%s3659_s4 + $0x28] sm:$0xff]  ;;  %v2398_v21 = vpack.c.bf16 %v1076_v53, %v1074_v48  ;;  %v1245_v12 = vld [vmem:[%s3660_s5 + $0x30] sm:$0xff]  ;;  %v3321_v48 = vpack.c.bf16 %v1254_v39, %v1252_v38 }
 0xe4e   :  { %v2201_v63 = vmul.f32 -1.442695, %v1030_v46  ;;  %v2400_v23 = vpack.c.bf16 %v1081_v16, %v1079_v45  ;;  %v1243_v46 = vld [vmem:[%s3660_s5 + $0x20] sm:$0xff]  ;;  %v1253_v53 = vld [vmem:[%s3660_s5 + $0x70] sm:$0xff] }
 0xe4f   :  { %2399 = vmatpush1.bf16.msra.mxu0 %v2398_v21  ;;  %v2202_v11 = vmul.f32 -1.442695, %v1031_v47  ;;  %v3329_v45 = vpack.c.bf16 %v1253_v53, %v1251_v49 }
 0xe50   :  { %2640 = vpow2.f32 %v2201_v63  ;;  %2401 = vmatprep.subr.bf16.mxu0 %v2400_v23  ;;  %v1248_v63 = vld [vmem:[%s3660_s5 + $0x48] sm:$0xff]  ;;  %v1063_v23 = vsel %vm1059_vm4, %v3080_v35, %v3195_v6 }
 0xe51   :  { %2642 = vtanh.f32 %v1031_v47  ;;  %v3293_v47 = vpack.c.bf16 %v1245_v12, %v1243_v46 }
 0xe53   :  { %2403 = vmatpush1.bf16.msra.mxu0 %v2402_v55  ;;  %v1072_v55 = vsel %vm1059_vm4, %v3195_v6, %v3080_v35  ;;  %v1095_v35 = vrot.slane %v1090_v14, %v77_v41  ;;  %v1099_v6 = vrot.slane %v1090_v14, %v81_v44 }
 0xe54   :  { %2405 = vmatprep.subr.bf16.mxu0 %v2404_v17 }
 0xe57   :  { %2407 = vmatpush1.bf16.msra.mxu0 %v2406_v57 }
 0xe58   :  { %2409 = vmatprep.subr.bf16.mxu0 %v2408_v19 }
 0xe5a   :  { %v2641_v8 = vpop.eup %2640 }
 0xe5b   :  { %v1035_v15 = vadd.f32 1.0, %v2641_v8  ;;  %v2643_v58 = vpop.eup %2642  ;;  %2411 = vmatpush1.bf16.msra.mxu0 %v2410_v2  ;;  %v1250_v8 = vld [vmem:[%s3660_s5 + $0x58] sm:$0xff] }
 0xe5c   :  { %2445 = vmatprep.subr.bf16.mxu0 %v3266_v54 }
 0xe5d   :  { %2644 = vrcp.f32 %v1035_v15  ;;  %v3303_v15 = vpack.c.bf16 %v1250_v8, %v1248_v63 }
 0xe5e   :  { %2646 = vpow2.f32 %v2202_v11 }
 0xe67   :  { %v2645_v13 = vpop.eup %2644 }
 0xe68   :  { %v1046_v9 = vmul.f32 %v2645_v13, %v2643_v58  ;;  %v2647_v25 = vpop.eup %2646  ;;  %v1045_v36 = vmul.f32 %v2645_v13, %v949_v61  ;;  %v1241_v61 = vld [vmem:[%s3660_s5 + $0x10] sm:$0xff]  ;;  %v1247_v58 = vld [vmem:[%s3660_s5 + $0x40] sm:$0xff] }
 0xe69   :  { %v1042_v18 = vadd.f32 1.0, %v2647_v25  ;;  %v3274_v52 = vpack.c.bf16 %v1241_v61, %v1239_v43  ;;  %v1249_v13 = vld [vmem:[%s3660_s5 + $0x50] sm:$0xff] }
 0xe6a   :  { %1048 = vrot.lane.b32.xlu0 %v1046_v9, %s2749_s0  ;;  %v3311_v9 = vpack.c.bf16 %v1249_v13, %v1247_v58 }
 0xe6b   :  { %2648 = vrcp.f32 %v1042_v18  ;;  %2415 = vmatpush1.bf16.msra.mxu1 %v3274_v52 }
 0xe6c   :  { %2417 = vmatprep.subr.bf16.mxu1 %v3285_v10 }
 0xe6f   :  { %2419 = vmatpush1.bf16.msra.mxu1 %v3293_v47 }
 0xe70   :  { %2421 = vmatprep.subr.bf16.mxu1 %v3303_v15 }
 0xe73   :  { %2423 = vmatpush1.bf16.msra.mxu1 %v3311_v9 }
 0xe74   :  { %2425 = vmatprep.subr.bf16.mxu1 %v3321_v48 }
 0xe75   :  { %v2649_v24 = vpop.eup %2648 }
 0xe77   :  { %2427 = vmatpush1.bf16.msra.mxu1 %v3329_v45 }
 0xe78   :  { %2429 = vmatprep.subr.bf16.mxu1 %v3266_v54 }
 0xe7a   :  { %1322 = vmatmul.mubr.f32.vlgmr.msra.gmra.mrb[10].mxu1 %v2748_v3 }
 0xe7b   :  { %2431 = vmatpush1.bf16.msra.mxu1 %v3274_v52  ;;  %1424 = vmatprep.mubr.f32.mxu1 %v2748_v3 }
 0xe7c   :  { %2433 = vmatprep.subr.bf16.mxu1 %v3285_v10 }
 0xe7f   :  { %2435 = vmatpush1.bf16.msra.mxu1 %v3293_v47 }
 0xe80   :  { %2437 = vmatprep.subr.bf16.mxu1 %v3303_v15 }
 0xe83   :  { %2439 = vmatpush1.bf16.msra.mxu1 %v3311_v9 }
 0xe84   :  { %2441 = vmatprep.subr.bf16.mxu1 %v3321_v48 }
 0xe87   :  { %2443 = vmatpush1.bf16.msra.mxu1 %v3329_v45 }
 0xe88   :  { %2461 = vmatprep.subr.bf16.mxu1 %v3266_v54 }
 0xedc   :  { %v1049_v32 = vpop.permute.xlu0 %1048 }
 0xedd   :  { %v1051_v29 = vadd.f32 %v1049_v32, %v1045_v36 }
 0xedf   :  { %2650 = vtanh.f32 %v1051_v29 }
 0xee9   :  { %v2651_v51 = vpop.eup %2650 }
 0xeea   :  { %v1053_v50 = vmul.f32 %v2651_v51, %v2649_v24 }
 0xeec   :  { %1056 = vrot.lane.b32.xlu1 %v1053_v50, %s2749_s0 }
 0xf4d   :  { %v1323_v4 = vpop.f32.mrb[10].mxu1 }
 0xf4e   :  { %v1325_v56 = vpop.f32.mrb[11].mxu1 }
 0xf5e   :  { %v1057_v16 = vpop.permute.xlu1 %1056 }
 0xf5f   :  { %v1060_v21 = vsel %vm1059_vm4, %v3065_v42, %v1057_v16  ;;  %v1073_v7 = vsel %vm1059_vm4, %v1057_v16, %v3065_v42 }
 0xf60   :  { %2203 = vmatmul.mubr.msk.f32.vlgmr.msra.gmra.mrb[22].mxu0 %vm241_vm3, %v1060_v21 }
 0xf61   :  { %1196 = vmatprep.mubr.f32.mxu0 %v2748_v3  ;;  %2447 = vmatpush1.bf16.msra.mxu0 %v3274_v52 }
 0xf62   :  { %2449 = vmatprep.subr.bf16.mxu0 %v3285_v10 }
 0xf64   :  { %2204 = vmatmul.mubr.msk.f32.gmra.mrb[24].mxu0 %vm241_vm3, %v1063_v23 }
 0xf65   :  { %1202 = vmatprep.mubr.f32.mxu0 %v2748_v3  ;;  %2451 = vmatpush1.bf16.msra.mxu0 %v3293_v47 }
 0xf66   :  { %2453 = vmatprep.subr.bf16.mxu0 %v3303_v15 }
 0xf68   :  { %2205 = vmatmul.mubr.msk.f32.gmra.mrb[26].mxu0 %vm241_vm3, %v1066_v28 }
 0xf69   :  { %1208 = vmatprep.mubr.f32.mxu0 %v2748_v3  ;;  %2455 = vmatpush1.bf16.msra.mxu0 %v3311_v9 }
 0xf6a   :  { %2457 = vmatprep.subr.bf16.mxu0 %v3321_v48 }
 0xf6c   :  { %2206 = vmatmul.mubr.msk.f32.gmra.mrb[28].mxu0 %vm241_vm3, %v1069_v30 }
 0xf6d   :  { %1214 = vmatprep.mubr.f32.mxu0 %v2748_v3  ;;  %2459 = vmatpush1.bf16.msra.mxu0 %v3329_v45 }
 0xf6e   :  { %2477 = vmatprep.subr.bf16.mxu0 %v3266_v54 }
 0xf70   :  { %2207 = vmatmul.mubr.msk.f32.gmra.mrb[30].mxu0 %vm241_vm3, %v1070_v33 }
 0xf71   :  { %1220 = vmatprep.mubr.f32.mxu0 %v2748_v3 }
 0xf74   :  { %2208 = vmatmul.mubr.msk.f32.gmra.mrb[32].mxu0 %vm241_vm3, %v1071_v59 }
 0xf75   :  { %1226 = vmatprep.mubr.f32.mxu0 %v2748_v3 }
 0xf78   :  { %2209 = vmatmul.mubr.msk.f32.gmra.mrb[34].mxu0 %vm241_vm3, %v1072_v55 }
 0xf79   :  { %1232 = vmatprep.mubr.f32.mxu0 %v2748_v3 }
 0xf7c   :  { %2210 = vmatmul.mubr.msk.f32.gmra.mrb[36].mxu0 %vm241_vm3, %v1073_v7 }
 0xf7d   :  { %1527 = vmatprep.mubr.f32.mxu0 %v2748_v3 }
0x1033   :  { %v1192_v17 = vpop.f32.mrb[22].mxu0 }
0x1034   :  { %v1194_v22 = vpop.f32.mrb[23].mxu0  ;;  %v3469_v16 = vadd.f32 %v1192_v17, %v1095_v35 }
0x1035   :  { %v3473_v28 = vadd.f32 %v1194_v22, %v1099_v6 }
0x1037   :  { %v1198_v60 = vpop.f32.mrb[24].mxu0 }
0x1038   :  { %v3397_v42 = vadd.f32 %v1198_v60, %v1095_v35  ;;  %v1200_v62 = vpop.f32.mrb[25].mxu0 }
0x1039   :  { %v3399_v20 = vadd.f32 %v1200_v62, %v1099_v6 }
0x103b   :  { %v1204_v57 = vpop.f32.mrb[26].mxu0 }
0x103c   :  { %v3401_v19 = vadd.f32 %v1204_v57, %v1095_v35  ;;  %v1206_v26 = vpop.f32.mrb[27].mxu0 }
0x103d   :  { %v3403_v0 = vadd.f32 %v1206_v26, %v1099_v6 }
0x103f   :  { %v1210_v2 = vpop.f32.mrb[28].mxu0 }
0x1040   :  { %v3405_v11 = vadd.f32 %v1210_v2, %v1095_v35  ;;  %v1212_v25 = vpop.f32.mrb[29].mxu0 }
0x1041   :  { %v3407_v41 = vadd.f32 %v1212_v25, %v1099_v6 }
0x1043   :  { %v1216_v40 = vpop.f32.mrb[30].mxu0 }
0x1044   :  { %v3409_v44 = vadd.f32 %v1216_v40, %v1095_v35  ;;  %v1218_v18 = vpop.f32.mrb[31].mxu0 }
0x1045   :  { %v3411_v36 = vadd.f32 %v1218_v18, %v1099_v6 }
0x1046   :  { %v1559_v32 = vsel %vm2971_vm1, %v3405_v11, %v3409_v44  ;;  %v1662_v29 = vsel %vm2971_vm1, %v3409_v44, %v3405_v11 }
0x1047   :  { %v1222_v24 = vpop.f32.mrb[32].mxu0  ;;  %v1560_v51 = vsel %vm2975_vm2, %v3407_v41, %v3411_v36  ;;  %v1663_v50 = vsel %vm2975_vm2, %v3411_v36, %v3407_v41 }
0x1048   :  { %v3429_v27 = vadd.f32 %v1222_v24, %v1095_v35  ;;  %v1224_v34 = vpop.f32.mrb[33].mxu0 }
0x1049   :  { %v3431_v43 = vadd.f32 %v1224_v34, %v1099_v6 }
0x104a   :  { %v1456_v61 = vsel %vm2971_vm1, %v3401_v19, %v3429_v27  ;;  %v1765_v31 = vsel %vm2971_vm1, %v3429_v27, %v3401_v19 }
0x104b   :  { %v1228_v37 = vpop.f32.mrb[34].mxu0  ;;  %v1457_v46 = vsel %vm2975_vm2, %v3403_v0, %v3431_v43  ;;  %v1766_v12 = vsel %vm2975_vm2, %v3431_v43, %v3403_v0 }
0x104c   :  { %v3449_v63 = vadd.f32 %v1228_v37, %v1095_v35  ;;  %v1230_v8 = vpop.f32.mrb[35].mxu0 }
0x104d   :  { %v3451_v58 = vadd.f32 %v1230_v8, %v1099_v6 }
0x104e   :  { %v1353_v13 = vsel %vm2971_vm1, %v3397_v42, %v3449_v63  ;;  %v1868_v38 = vsel %vm2971_vm1, %v3449_v63, %v3397_v42 }
0x104f   :  { %v1234_v39 = vpop.f32.mrb[36].mxu0  ;;  %v1354_v49 = vsel %vm2975_vm2, %v3399_v20, %v3451_v58  ;;  %v1869_v53 = vsel %vm2975_vm2, %v3451_v58, %v3399_v20 }
0x1050   :  { %v3471_v21 = vadd.f32 %v1234_v39, %v1095_v35  ;;  %v1236_v23 = vpop.f32.mrb[37].mxu0 }
0x1051   :  { %v3475_v30 = vadd.f32 %v1236_v23, %v1099_v6 }
0x1052   :  { %v1255_v33 = vsel %vm2971_vm1, %v3469_v16, %v3471_v21  ;;  %v1971_v59 = vsel %vm2971_vm1, %v3471_v21, %v3469_v16  ;;  %v2750_v16 = vmov 0.0|0.0   ;;  %v2075_v21 = vld [vmem:[%s3662_s7 + $0x8] sm:$0xff] }
0x1053   :  { %v1328_v55 = vadd.f32 %v1323_v4, %v1255_v33  ;;  %v1256_v7 = vsel %vm2975_vm2, %v3473_v28, %v3475_v30  ;;  %v1972_v14 = vsel %vm2975_vm2, %v3475_v30, %v3473_v28  ;;  %v2076_v28 = vld [vmem:[%s3662_s7 + $0x10] sm:$0xff]  ;;  %v2541_v30 = vpack.c.bf16 %v2075_v21, %v2074_v5 }
0x1054   :  { %v1329_v17 = vadd.f32 %v1325_v56, %v1256_v7 }
0x1055   :  { %v2211_v22 = vmul.f32 -1.442695, %v1328_v55 }
0x1056   :  { %v2212_v57 = vmul.f32 -1.442695, %v1329_v17 }
0x1057   :  { %2652 = vpow2.f32 %v2211_v22 }
0x1058   :  { %2654 = vtanh.f32 %v1329_v17 }
0x1061   :  { %v2653_v35 = vpop.eup %2652 }
0x1062   :  { %v1333_v6 = vadd.f32 1.0, %v2653_v35  ;;  %v2655_v60 = vpop.eup %2654 }
0x1064   :  { %2656 = vrcp.f32 %v1333_v6 }
0x1065   :  { %2658 = vpow2.f32 %v2212_v57 }
0x106e   :  { %v2657_v62 = vpop.eup %2656 }
0x106f   :  { %v1344_v4 = vmul.f32 %v2657_v62, %v2655_v60  ;;  %v2659_v26 = vpop.eup %2658  ;;  %v1343_v25 = vmul.f32 0.0, %v2657_v62 }
0x1070   :  { %v1340_v2 = vadd.f32 1.0, %v2659_v26 }
0x1071   :  { %1346 = vrot.lane.b32.xlu0 %v1344_v4, %s2749_s0 }
0x1072   :  { %2660 = vrcp.f32 %v1340_v2 }
0x107c   :  { %v2661_v56 = vpop.eup %2660 }
0x10e3   :  { %v1347_v40 = vpop.permute.xlu0 %1346 }
0x10e4   :  { %v1349_v18 = vadd.f32 %v1347_v40, %v1343_v25 }
0x10e6   :  { %2662 = vtanh.f32 %v1349_v18 }
0x10f0   :  { %v2663_v24 = vpop.eup %2662 }
0x10f1   :  { %v3494_v34 = vmul.f32 %v2663_v24, %v2661_v56 }
0x10f3   :  { %1356 = vrot.lane.b32.xlu1 %v3494_v34, %s2749_s0 }
0x1165   :  { %v1357_v37 = vpop.permute.xlu1 %1356 }
0x1166   :  { %2213 = vmatmul.mubr.msk.f32.vlgmr.msra.gmra.mrb[12].mxu1 %vm241_vm3, %v1357_v37 }
0x1167   :  { %2463 = vmatpush1.bf16.msra.mxu1 %v3274_v52  ;;  %1630 = vmatprep.mubr.f32.mxu1 %v2748_v3 }
0x1168   :  { %2465 = vmatprep.subr.bf16.mxu1 %v3285_v10 }
0x116b   :  { %2467 = vmatpush1.bf16.msra.mxu1 %v3293_v47 }
0x116c   :  { %2469 = vmatprep.subr.bf16.mxu1 %v3303_v15 }
0x116f   :  { %2471 = vmatpush1.bf16.msra.mxu1 %v3311_v9 }
0x1170   :  { %2473 = vmatprep.subr.bf16.mxu1 %v3321_v48 }
0x1173   :  { %2475 = vmatpush1.bf16.msra.mxu1 %v3329_v45 }
0x1174   :  { %2493 = vmatprep.subr.bf16.mxu1 %v3266_v54 }
0x1239   :  { %v1426_v8 = vpop.f32.mrb[12].mxu1 }
0x123a   :  { %v1431_v39 = vadd.f32 %v1426_v8, %v1353_v13  ;;  %v1428_v23 = vpop.f32.mrb[13].mxu1 }
0x123b   :  { %v1432_v33 = vadd.f32 %v1428_v23, %v1354_v49 }
0x123c   :  { %v2214_v55 = vmul.f32 -1.442695, %v1431_v39 }
0x123d   :  { %v2215_v60 = vmul.f32 -1.442695, %v1432_v33 }
0x123e   :  { %2664 = vpow2.f32 %v2214_v55 }
0x123f   :  { %2666 = vtanh.f32 %v1432_v33 }
0x1248   :  { %v2665_v7 = vpop.eup %2664 }
0x1249   :  { %v1436_v17 = vadd.f32 1.0, %v2665_v7  ;;  %v2667_v22 = vpop.eup %2666 }
0x124b   :  { %2668 = vrcp.f32 %v1436_v17 }
0x124c   :  { %2670 = vpow2.f32 %v2215_v60 }
0x1255   :  { %v2669_v35 = vpop.eup %2668 }
0x1256   :  { %v1447_v6 = vmul.f32 %v2669_v35, %v2667_v22  ;;  %v2671_v62 = vpop.eup %2670  ;;  %v1446_v57 = vmul.f32 %v2669_v35, %v1349_v18 }
0x1257   :  { %v1443_v4 = vadd.f32 1.0, %v2671_v62 }
0x1258   :  { %1449 = vrot.lane.b32.xlu0 %v1447_v6, %s2749_s0 }
0x1259   :  { %2672 = vrcp.f32 %v1443_v4 }
0x1263   :  { %v2673_v49 = vpop.eup %2672 }
0x12ca   :  { %v1450_v26 = vpop.permute.xlu0 %1449 }
0x12cb   :  { %v1452_v13 = vadd.f32 %v1450_v26, %v1446_v57 }
0x12cd   :  { %2674 = vtanh.f32 %v1452_v13 }
0x12d7   :  { %v2675_v2 = vpop.eup %2674 }
0x12d8   :  { %v1454_v25 = vmul.f32 %v2675_v2, %v2673_v49 }
0x12da   :  { %1459 = vrot.lane.b32.xlu1 %v1454_v25, %s2749_s0  ;;  %v1455_v4 = vadd.f32 %v1454_v25, %v3494_v34 }
0x134c   :  { %v1460_v40 = vpop.permute.xlu1 %1459 }
0x134d   :  { %2216 = vmatmul.mubr.msk.f32.vlgmr.msra.gmra.mrb[38].mxu0 %vm241_vm3, %v1460_v40 }
0x134e   :  { %2479 = vmatpush1.bf16.msra.mxu0 %v3274_v52  ;;  %1733 = vmatprep.mubr.f32.mxu0 %v2748_v3 }
0x134f   :  { %2481 = vmatprep.subr.bf16.mxu0 %v3285_v10 }
0x1352   :  { %2483 = vmatpush1.bf16.msra.mxu0 %v3293_v47 }
0x1353   :  { %2485 = vmatprep.subr.bf16.mxu0 %v3303_v15 }
0x1356   :  { %2487 = vmatpush1.bf16.msra.mxu0 %v3311_v9 }
0x1357   :  { %2489 = vmatprep.subr.bf16.mxu0 %v3321_v48 }
0x135a   :  { %2491 = vmatpush1.bf16.msra.mxu0 %v3329_v45 }
0x135b   :  { %2509 = vmatprep.subr.bf16.mxu0 %v3266_v54 }
0x1420   :  { %v1529_v18 = vpop.f32.mrb[38].mxu0 }
0x1421   :  { %v1534_v56 = vadd.f32 %v1529_v18, %v1456_v61  ;;  %v1531_v24 = vpop.f32.mrb[39].mxu0 }
0x1422   :  { %v1535_v37 = vadd.f32 %v1531_v24, %v1457_v46 }
0x1423   :  { %v2217_v8 = vmul.f32 -1.442695, %v1534_v56 }
0x1424   :  { %v2218_v17 = vmul.f32 -1.442695, %v1535_v37 }
0x1425   :  { %2676 = vpow2.f32 %v2217_v8 }
0x1426   :  { %2678 = vtanh.f32 %v1535_v37 }
0x142f   :  { %v2677_v39 = vpop.eup %2676 }
0x1430   :  { %v1539_v23 = vadd.f32 1.0, %v2677_v39  ;;  %v2679_v33 = vpop.eup %2678 }
0x1432   :  { %2680 = vrcp.f32 %v1539_v23 }
0x1433   :  { %2682 = vpow2.f32 %v2218_v17 }
0x143c   :  { %v2681_v55 = vpop.eup %2680 }
0x143d   :  { %v1550_v7 = vmul.f32 %v2681_v55, %v2679_v33  ;;  %v2683_v61 = vpop.eup %2682  ;;  %v1549_v35 = vmul.f32 %v2681_v55, %v1452_v13 }
0x143e   :  { %v1546_v22 = vadd.f32 1.0, %v2683_v61 }
0x143f   :  { %1552 = vrot.lane.b32.xlu0 %v1550_v7, %s2749_s0 }
0x1440   :  { %2684 = vrcp.f32 %v1546_v22 }
0x144a   :  { %v2685_v46 = vpop.eup %2684 }
0x14b1   :  { %v1553_v6 = vpop.permute.xlu0 %1552 }
0x14b2   :  { %v1555_v60 = vadd.f32 %v1553_v6, %v1549_v35 }
0x14b4   :  { %2686 = vtanh.f32 %v1555_v60 }
0x14be   :  { %v2687_v62 = vpop.eup %2686 }
0x14bf   :  { %v1557_v57 = vmul.f32 %v2687_v62, %v2685_v46 }
0x14c1   :  { %1562 = vrot.lane.b32.xlu1 %v1557_v57, %s2749_s0  ;;  %v1558_v26 = vadd.f32 %v1557_v57, %v1455_v4 }
0x1533   :  { %v1563_v49 = vpop.permute.xlu1 %1562 }
0x1534   :  { %2219 = vmatmul.mubr.msk.f32.vlgmr.msra.gmra.mrb[14].mxu1 %vm241_vm3, %v1563_v49 }
0x1535   :  { %2495 = vmatpush1.bf16.msra.mxu1 %v3274_v52  ;;  %1836 = vmatprep.mubr.f32.mxu1 %v2748_v3 }
0x1536   :  { %2497 = vmatprep.subr.bf16.mxu1 %v3285_v10 }
0x1539   :  { %2499 = vmatpush1.bf16.msra.mxu1 %v3293_v47 }
0x153a   :  { %2501 = vmatprep.subr.bf16.mxu1 %v3303_v15 }
0x153d   :  { %2503 = vmatpush1.bf16.msra.mxu1 %v3311_v9 }
0x153e   :  { %2505 = vmatprep.subr.bf16.mxu1 %v3321_v48 }
0x1541   :  { %2507 = vmatpush1.bf16.msra.mxu1 %v3329_v45 }
0x1542   :  { %2525 = vmatprep.subr.bf16.mxu1 %v3266_v54 }
0x1607   :  { %v1632_v34 = vpop.f32.mrb[14].mxu1 }
0x1608   :  { %v1637_v13 = vadd.f32 %v1632_v34, %v1559_v32  ;;  %v1634_v2 = vpop.f32.mrb[15].mxu1 }
0x1609   :  { %v1638_v25 = vadd.f32 %v1634_v2, %v1560_v51 }
0x160a   :  { %v2220_v40 = vmul.f32 -1.442695, %v1637_v13 }
0x160b   :  { %v2221_v8 = vmul.f32 -1.442695, %v1638_v25 }
0x160c   :  { %2688 = vpow2.f32 %v2220_v40 }
0x160d   :  { %2690 = vtanh.f32 %v1638_v25 }
0x1616   :  { %v2689_v18 = vpop.eup %2688 }
0x1617   :  { %v1642_v56 = vadd.f32 1.0, %v2689_v18  ;;  %v2691_v54 = vpop.eup %2690 }
0x1619   :  { %2692 = vrcp.f32 %v1642_v56 }
0x161a   :  { %2694 = vpow2.f32 %v2221_v8 }
0x1623   :  { %v2693_v24 = vpop.eup %2692 }
0x1624   :  { %v1653_v37 = vmul.f32 %v2693_v24, %v2691_v54  ;;  %v2695_v32 = vpop.eup %2694  ;;  %v1652_v23 = vmul.f32 %v2693_v24, %v1555_v60 }
0x1625   :  { %v1649_v39 = vadd.f32 1.0, %v2695_v32 }
0x1626   :  { %1655 = vrot.lane.b32.xlu0 %v1653_v37, %s2749_s0 }
0x1627   :  { %2696 = vrcp.f32 %v1649_v39 }
0x1631   :  { %v2697_v51 = vpop.eup %2696 }
0x1698   :  { %v1656_v33 = vpop.permute.xlu0 %1655 }
0x1699   :  { %v1658_v55 = vadd.f32 %v1656_v33, %v1652_v23 }
0x169b   :  { %2698 = vtanh.f32 %v1658_v55 }
0x16a5   :  { %v2699_v7 = vpop.eup %2698 }
0x16a6   :  { %v1660_v17 = vmul.f32 %v2699_v7, %v2697_v51 }
0x16a8   :  { %1665 = vrot.lane.b32.xlu1 %v1660_v17, %s2749_s0  ;;  %v1661_v61 = vadd.f32 %v1660_v17, %v1558_v26 }
0x171a   :  { %v1666_v22 = vpop.permute.xlu1 %1665 }
0x171b   :  { %2222 = vmatmul.mubr.msk.f32.vlgmr.msra.gmra.mrb[40].mxu0 %vm241_vm3, %v1666_v22 }
0x171c   :  { %2511 = vmatpush1.bf16.msra.mxu0 %v3274_v52  ;;  %1939 = vmatprep.mubr.f32.mxu0 %v2748_v3 }
0x171d   :  { %2513 = vmatprep.subr.bf16.mxu0 %v3285_v10 }
0x1720   :  { %2515 = vmatpush1.bf16.msra.mxu0 %v3293_v47 }
0x1721   :  { %2517 = vmatprep.subr.bf16.mxu0 %v3303_v15 }
0x1724   :  { %2519 = vmatpush1.bf16.msra.mxu0 %v3311_v9 }
0x1725   :  { %2521 = vmatprep.subr.bf16.mxu0 %v3321_v48 }
0x1728   :  { %2523 = vmatpush1.bf16.msra.mxu0 %v3329_v45 }
0x1729   :  { %2540 = vmatprep.subr.bf16.mxu0 %v2750_v16 }
0x17ee   :  { %v1735_v35 = vpop.f32.mrb[40].mxu0 }
0x17ef   :  { %v1740_v6 = vadd.f32 %v1735_v35, %v1662_v29  ;;  %v1737_v60 = vpop.f32.mrb[41].mxu0 }
0x17f0   :  { %v1741_v46 = vadd.f32 %v1737_v60, %v1663_v50 }
0x17f1   :  { %v2223_v62 = vmul.f32 -1.442695, %v1740_v6 }
0x17f2   :  { %v2224_v11 = vmul.f32 -1.442695, %v1741_v46 }
0x17f3   :  { %2700 = vpow2.f32 %v2223_v62 }
0x17f4   :  { %2702 = vtanh.f32 %v1741_v46 }
0x17fd   :  { %v2701_v4 = vpop.eup %2700 }
0x17fe   :  { %v1745_v57 = vadd.f32 1.0, %v2701_v4  ;;  %v2703_v26 = vpop.eup %2702 }
0x1800   :  { %2704 = vrcp.f32 %v1745_v57 }
0x1801   :  { %2706 = vpow2.f32 %v2224_v11 }
0x180a   :  { %v2705_v49 = vpop.eup %2704 }
0x180b   :  { %v1756_v34 = vmul.f32 %v2705_v49, %v2703_v26  ;;  %v2707_v44 = vpop.eup %2706  ;;  %v1755_v13 = vmul.f32 %v2705_v49, %v1658_v55 }
0x180c   :  { %v1752_v29 = vadd.f32 1.0, %v2707_v44 }
0x180d   :  { %1758 = vrot.lane.b32.xlu0 %v1756_v34, %s2749_s0 }
0x180e   :  { %2708 = vrcp.f32 %v1752_v29 }
0x1818   :  { %v2709_v41 = vpop.eup %2708 }
0x187f   :  { %v1759_v2 = vpop.permute.xlu0 %1758 }
0x1880   :  { %v1761_v25 = vadd.f32 %v1759_v2, %v1755_v13 }
0x1882   :  { %2710 = vtanh.f32 %v1761_v25 }
0x188c   :  { %v2711_v36 = vpop.eup %2710 }
0x188d   :  { %v1763_v50 = vmul.f32 %v2711_v36, %v2709_v41  ;;  %v2078_v36 = vld [vmem:[%s3662_s7 + $0x20] sm:$0xff] }
0x188f   :  { %1768 = vrot.lane.b32.xlu1 %v1763_v50, %s2749_s0  ;;  %v1764_v40 = vadd.f32 %v1763_v50, %v1661_v61  ;;  %v2079_v50 = vld [vmem:[%s3662_s7 + $0x28] sm:$0xff] }
0x1901   :  { %v1769_v18 = vpop.permute.xlu1 %1768 }
0x1902   :  { %2225 = vmatmul.mubr.msk.f32.vlgmr.msra.gmra.mrb[16].mxu1 %vm241_vm3, %v1769_v18  ;;  %v2081_v18 = vld [vmem:[%s3662_s7 + $0x38] sm:$0xff] }
0x1903   :  { %2527 = vmatpush1.bf16.msra.mxu1 %v3274_v52  ;;  %2042 = vmatprep.mubr.f32.mxu1 %v2748_v3 }
0x1904   :  { %2529 = vmatprep.subr.bf16.mxu1 %v3285_v10 }
0x1907   :  { %2531 = vmatpush1.bf16.msra.mxu1 %v3293_v47 }
0x1908   :  { %2533 = vmatprep.subr.bf16.mxu1 %v3303_v15 }
0x190b   :  { %2535 = vmatpush1.bf16.msra.mxu1 %v3311_v9 }
0x190c   :  { %2537 = vmatprep.subr.bf16.mxu1 %v3321_v48 }
0x190f   :  { %2539 = vmatpush1.bf16.msra.mxu1 %v3329_v45 }
0x19d5   :  { %v1838_v56 = vpop.f32.mrb[16].mxu1 }
0x19d6   :  { %v1843_v52 = vadd.f32 %v1838_v56, %v1765_v31  ;;  %v1840_v54 = vpop.f32.mrb[17].mxu1 }
0x19d7   :  { %v1844_v10 = vadd.f32 %v1840_v54, %v1766_v12 }
0x19d8   :  { %v2226_v47 = vmul.f32 -1.442695, %v1843_v52 }
0x19d9   :  { %v2227_v19 = vmul.f32 -1.442695, %v1844_v10 }
0x19da   :  { %2712 = vpow2.f32 %v2226_v47 }
0x19db   :  { %2714 = vtanh.f32 %v1844_v10 }
0x19e4   :  { %v2713_v15 = vpop.eup %2712 }
0x19e5   :  { %v1848_v9 = vadd.f32 1.0, %v2713_v15  ;;  %v2715_v48 = vpop.eup %2714 }
0x19e7   :  { %2716 = vrcp.f32 %v1848_v9 }
0x19e8   :  { %2718 = vpow2.f32 %v2227_v19 }
0x19f1   :  { %v2717_v45 = vpop.eup %2716 }
0x19f2   :  { %v1859_v24 = vmul.f32 %v2717_v45, %v2715_v48  ;;  %v2719_v27 = vpop.eup %2718  ;;  %v1858_v37 = vmul.f32 %v2717_v45, %v1761_v25 }
0x19f3   :  { %v1855_v31 = vadd.f32 1.0, %v2719_v27 }
0x19f4   :  { %1861 = vrot.lane.b32.xlu0 %v1859_v24, %s2749_s0 }
0x19f5   :  { %2720 = vrcp.f32 %v1855_v31 }
0x19ff   :  { %v2721_v0 = vpop.eup %2720 }
0x1a66   :  { %v1862_v8 = vpop.permute.xlu0 %1861 }
0x1a67   :  { %v1864_v32 = vadd.f32 %v1862_v8, %v1858_v37  ;;  %v2235_v37 = vld [vmem:[%s3663_s8] ss:$0 sm:$0xff] }
0x1a69   :  { %2722 = vtanh.f32 %v1864_v32 }
0x1a73   :  { %v2723_v43 = vpop.eup %2722 }
0x1a74   :  { %v1866_v12 = vmul.f32 %v2723_v43, %v2721_v0 }
0x1a76   :  { %1871 = vrot.lane.b32.xlu1 %v1866_v12, %s2749_s0  ;;  %v1867_v39 = vadd.f32 %v1866_v12, %v1764_v40  ;;  %v2547_v40 = vpack.c.bf16 %v2079_v50, %v2078_v36 }
0x1ae8   :  { %v1872_v23 = vpop.permute.xlu1 %1871 }
0x1ae9   :  { %2228 = vmatmul.mubr.msk.f32.vlgmr.msra.gmra.mrb[42].mxu0 %vm241_vm3, %v1872_v23 }
0x1aea   :  { %2261 = vmatprep.mubr.msk.f32.mxu0 %vm2751_vm5, %v2748_v3  ;;  %2542 = vmatpush3.bf16.msra.mxu0 %v2541_v30  ;;  %v2080_v3 = vld [vmem:[%s3662_s7 + $0x30] sm:$0xff] }
0x1aeb   :  { %2543 = vmatprep.subr.bf16.mxu0 %v2750_v16  ;;  %v2550_v56 = vpack.c.bf16 %v2081_v18, %v2080_v3 }
0x1bbc   :  { %v1941_v33 = vpop.f32.mrb[42].mxu0 }
0x1bbd   :  { %v1946_v55 = vadd.f32 %v1941_v33, %v1868_v38  ;;  %v1943_v51 = vpop.f32.mrb[43].mxu0 }
0x1bbe   :  { %v1947_v7 = vadd.f32 %v1943_v51, %v1869_v53 }
0x1bbf   :  { %v2229_v17 = vmul.f32 -1.442695, %v1946_v55 }
0x1bc0   :  { %v2230_v42 = vmul.f32 -1.442695, %v1947_v7 }
0x1bc1   :  { %2724 = vpow2.f32 %v2229_v17 }
0x1bc2   :  { %2726 = vtanh.f32 %v1947_v7 }
0x1bcb   :  { %v2725_v61 = vpop.eup %2724 }
0x1bcc   :  { %v1951_v22 = vadd.f32 1.0, %v2725_v61  ;;  %v2727_v35 = vpop.eup %2726 }
0x1bce   :  { %2728 = vrcp.f32 %v1951_v22 }
0x1bcf   :  { %2730 = vpow2.f32 %v2230_v42 }
0x1bd8   :  { %v2729_v6 = vpop.eup %2728 }
0x1bd9   :  { %v1962_v60 = vmul.f32 %v2729_v6, %v2727_v35  ;;  %v2731_v63 = vpop.eup %2730  ;;  %v1961_v46 = vmul.f32 %v2729_v6, %v1864_v32 }
0x1bda   :  { %v1958_v38 = vadd.f32 1.0, %v2731_v63 }
0x1bdb   :  { %1964 = vrot.lane.b32.xlu0 %v1962_v60, %s2749_s0 }
0x1bdc   :  { %2732 = vrcp.f32 %v1958_v38 }
0x1be6   :  { %v2733_v20 = vpop.eup %2732 }
0x1c4d   :  { %v1965_v62 = vpop.permute.xlu0 %1964 }
0x1c4e   :  { %v1967_v4 = vadd.f32 %v1965_v62, %v1961_v46 }
0x1c50   :  { %2734 = vtanh.f32 %v1967_v4 }
0x1c5a   :  { %v2735_v58 = vpop.eup %2734 }
0x1c5b   :  { %v1969_v53 = vmul.f32 %v2735_v58, %v2733_v20 }
0x1c5d   :  { %1974 = vrot.lane.b32.xlu1 %v1969_v53, %s2749_s0  ;;  %v1970_v57 = vadd.f32 %v1969_v53, %v1867_v39 }
0x1ccf   :  { %v1975_v26 = vpop.permute.xlu1 %1974 }
0x1cd0   :  { %2231 = vmatmul.mubr.msk.f32.vlgmr.msra.gmra.mrb[18].mxu1 %vm241_vm3, %v1975_v26 }
0x1da3   :  { %v2044_v49 = vpop.f32.mrb[18].mxu1 }
0x1da4   :  { %v2049_v34 = vadd.f32 %v2044_v49, %v1971_v59  ;;  %v2046_v11 = vpop.f32.mrb[19].mxu1  ;;  %v2077_v59 = vld [vmem:[%s3662_s7 + $0x18] sm:$0xff] }
0x1da5   :  { %v2050_v44 = vadd.f32 %v2046_v11, %v1972_v14  ;;  %v2544_v14 = vpack.c.bf16 %v2077_v59, %v2076_v28 }
0x1da6   :  { %v2232_v29 = vmul.f32 -1.442695, %v2049_v34 }
0x1da7   :  { %2545 = vmatpush3.bf16.msra.mxu0 %v2544_v14  ;;  %v2233_v52 = vmul.f32 -1.442695, %v2050_v44 }
0x1da8   :  { %2736 = vpow2.f32 %v2232_v29  ;;  %2546 = vmatprep.subr.bf16.mxu0 %v2750_v16 }
0x1da9   :  { %2738 = vtanh.f32 %v2050_v44 }
0x1dab   :  { %2548 = vmatpush3.bf16.msra.mxu0 %v2547_v40 }
0x1dac   :  { %2549 = vmatprep.subr.bf16.mxu0 %v2750_v16 }
0x1daf   :  { %2551 = vmatpush3.bf16.msra.mxu0 %v2550_v56 }
0x1db2   :  { %v2737_v13 = vpop.eup %2736 }
0x1db3   :  { %v2054_v2 = vadd.f32 1.0, %v2737_v13  ;;  %v2739_v25 = vpop.eup %2738 }
0x1db5   :  { %2740 = vrcp.f32 %v2054_v2 }
0x1db6   :  { %2742 = vpow2.f32 %v2233_v52 }
0x1dbf   :  { %v2741_v41 = vpop.eup %2740 }
0x1dc0   :  { %v2065_v1 = vmul.f32 %v2741_v41, %v2739_v25  ;;  %v2743_v54 = vpop.eup %2742  ;;  %v2064_v47 = vmul.f32 %v2741_v41, %v1967_v4 }
0x1dc1   :  { %v2061_v10 = vadd.f32 1.0, %v2743_v54 }
0x1dc2   :  { %2067 = vrot.lane.b32.xlu0 %v2065_v1, %s2749_s0 }
0x1dc3   :  { %2744 = vrcp.f32 %v2061_v10 }
0x1dcd   :  { %v2745_v48 = vpop.eup %2744 }
0x1e34   :  { %v2068_v15 = vpop.permute.xlu0 %2067 }
0x1e35   :  { %v2070_v9 = vadd.f32 %v2068_v15, %v2064_v47 }
0x1e37   :  { %2746 = vtanh.f32 %v2070_v9 }
0x1e41   :  { %v2747_v45 = vpop.eup %2746 }
0x1e42   :  { %v2072_v24 = vmul.f32 %v2747_v45, %v2745_v48 }
0x1e44   :  { %v2073_v19 = vadd.f32 %v2072_v24, %v1970_v57 }
0x1e46   :  { %2083 = vrot.lane.b32.xlu1 %v2073_v19, %s2749_s0 }
0x1eb8   :  { %v2084_v27 = vpop.permute.xlu1 %2083 }
0x1eb9   :  { %2262 = vmatmul.mubr.msk.f32.vlgmr.msra.gmra.mrb[44].mxu0 %vm241_vm3, %v2084_v27 }
0x1f8c   :  { %v2153_v31 = vpop.f32.mrb[44].mxu0 }
0x1f8d   :  { %v2157_v8 = vmul.f32 0.125, %v2153_v31  ;;  %v2263_v32 = vpop.f32.mrb[45].mxu0 }
0x1f8f   :  { %v2165_v0 = vadd.f32 %v2235_v37, %v2157_v8 }
0x1f91   :  { %2167 = vst.msk [vmem:[%s3664_s9] sm:$0xff] %vm2166_vm6, %v2165_v0 }

</bundles_post_ra>
